<compile_context>
chip_gen: v6e
topology: v6e:2x2x1
jax: 0.10.0
libtpu: 0.0.40
codegen_flags: <defaults>
</compile_context>

<pallas_src>
import jax
import jax.numpy as jnp
from jax.experimental import pallas as pl
from jax.experimental.pallas import tpu as pltpu


# ---------------------------------------------------------------------------
# Fused kernel:
#   x1   = LeakyReLU(x @ W1^T + b1)
#   x1   = x1 * (x1 @ Wa^T + ba)                  (Attention)
#   G_in = x1 @ W_ih^T + (b_ih + b_hh)            (hoisted input projection)
#   for t:  gates = G_in[t] + h @ W_hh^T ; LSTM cell update (PyTorch i,f,g,o)
#   out  = h_T @ W2^T + b2                        (== linear2(lstm_out)[:, -1])
# ---------------------------------------------------------------------------
def _fused_lstm_kernel(x_ref, w1t_ref, b1_ref, wa_ref, ba_ref,
                       wiht_ref, whht_ref, bcomb_ref, w2t_ref, b2_ref,
                       out_ref, gin_ref):
    hdim = w1t_ref.shape[1]
    batch = out_ref.shape[0]
    seq = x_ref.shape[0] // batch          # rows are time-major: row = t*B + b

    # ---- linear1 + LeakyReLU (slope 0.01) over the whole (T*B, D) slab ----
    x1 = jnp.dot(x_ref[...], w1t_ref[...], preferred_element_type=jnp.float32)
    x1 = x1 + b1_ref[...]
    x1 = jnp.where(x1 >= 0.0, x1, 0.01 * x1)

    # ---- attention: per-row scalar weight = x1 @ Wa^T + ba (XLU reduction) --
    w = jnp.sum(x1 * wa_ref[...], axis=-1, keepdims=True) + ba_ref[0]
    x1 = x1 * w

    # ---- time-independent gate projection for ALL timesteps (bias once), ----
    # ---- parked in VMEM scratch so it never occupies vregs across the loop --
    gin_ref[...] = (jnp.dot(x1, wiht_ref[...],
                            preferred_element_type=jnp.float32)
                    + bcomb_ref[...])      # (T*B, 4H)

    # ---- LSTM recurrence, fully unrolled static loop over T ----
    whht = whht_ref[...]                   # hoisted VMEM load (H, 4H)
    h = jnp.zeros((batch, hdim), jnp.float32)
    c = jnp.zeros((batch, hdim), jnp.float32)
    for t in range(seq):                   # static, sublane-aligned slices
        gates = gin_ref[t * batch:(t + 1) * batch, :] + jnp.dot(
            h, whht, preferred_element_type=jnp.float32)
        # PyTorch gate order: i, f, g, o.  With H = 128 each slice is a full
        # 128-lane column of the (B, 4H) tile.
        i_g = jax.nn.sigmoid(gates[:, 0 * hdim:1 * hdim])
        f_g = jax.nn.sigmoid(gates[:, 1 * hdim:2 * hdim])
        g_g = jnp.tanh(gates[:, 2 * hdim:3 * hdim])
        o_g = jax.nn.sigmoid(gates[:, 3 * hdim:4 * hdim])
        c = f_g * c + i_g * g_g
        h = o_g * jnp.tanh(c)

    # ---- final linear on the last hidden state (== x2[:, -1, :]) ----
    out_ref[...] = (jnp.dot(h, w2t_ref[...], preferred_element_type=jnp.float32)
                    + b2_ref[...])


def fused_forward(x_tb, w1_t, b1, wa, ba, wih_t, whh_t, b_comb, w2_t, b2,
                  batch):
    n, d = x_tb.shape
    h = w1_t.shape[1]
    o = w2_t.shape[1]
    return pl.pallas_call(
        _fused_lstm_kernel,
        out_shape=jax.ShapeDtypeStruct((batch, o), jnp.float32),
        grid=(1,),
        in_specs=[
            pl.BlockSpec((n, d), lambda i: (0, 0)),             # x  (T*B, D)
            pl.BlockSpec((d, h), lambda i: (0, 0)),             # W1^T
            pl.BlockSpec((1, h), lambda i: (0, 0)),             # b1
            pl.BlockSpec((1, h), lambda i: (0, 0)),             # Wa
            pl.BlockSpec(memory_space=pltpu.MemorySpace.SMEM),  # ba scalar
            pl.BlockSpec((h, 4 * h), lambda i: (0, 0)),         # W_ih^T
            pl.BlockSpec((h, 4 * h), lambda i: (0, 0)),         # W_hh^T
            pl.BlockSpec((1, 4 * h), lambda i: (0, 0)),         # b_ih + b_hh
            pl.BlockSpec((h, o), lambda i: (0, 0)),             # W2^T
            pl.BlockSpec((1, o), lambda i: (0, 0)),             # b2
        ],
        out_specs=pl.BlockSpec((batch, o), lambda i: (0, 0)),
        scratch_shapes=[pltpu.VMEM((n, 4 * h), jnp.float32)],   # G_in
        compiler_params=pltpu.CompilerParams(
            dimension_semantics=("arbitrary",)),
    )(x_tb, w1_t, b1, wa, ba, wih_t, whh_t, b_comb, w2_t, b2)


# ---------------------------------------------------------------------------
# Model wrapper (only glue: tiny input transpose + param prep)
# ---------------------------------------------------------------------------
@jax.jit
def model_forward(x0, params):
    b, t, d = x0.shape
    h = params["W1"].shape[0]
    o = params["W2"].shape[0]

    # Time-major rows (row = t*B + b): the only transpose is of the raw input
    # x0 (a few KB); the hidden-size intermediate never leaves VMEM.
    x_tb = x0.transpose(1, 0, 2).reshape(t * b, d)
    b_comb = (params["b_ih"] + params["b_hh"]).reshape(1, 4 * h)

    return fused_forward(
        x_tb,
        params["W1"].T,                    # (D, H)
        params["b1"].reshape(1, h),
        params["Wa"].reshape(1, h),
        params["ba"].reshape(1),           # scalar -> SMEM
        params["W_ih"].T,                  # (H, 4H)
        params["W_hh"].T,                  # (H, 4H)
        b_comb,
        params["W2"].T,                    # (H, O)
        params["b2"].reshape(1, o),
        batch=b,
    )                                      # (B, O) == x2[:, -1, :]


# ---------------------------------------------------------------------------
# Pure-JAX reference for correctness check
# ---------------------------------------------------------------------------
def reference_forward(x0, params):
    x1 = x0 @ params["W1"].T + params["b1"]
    x1 = jnp.where(x1 >= 0.0, x1, 0.01 * x1)
    w = x1 @ params["Wa"].T + params["ba"]
    x1 = x1 * w
    b, t, h = x1.shape
    hs = jnp.zeros((b, h), jnp.float32)
    cs = jnp.zeros((b, h), jnp.float32)
    for step in range(t):
        gates = (x1[:, step, :] @ params["W_ih"].T + params["b_ih"]
                 + hs @ params["W_hh"].T + params["b_hh"])
        i_g = jax.nn.sigmoid(gates[:, 0 * h:1 * h])
        f_g = jax.nn.sigmoid(gates[:, 1 * h:2 * h])
        g_g = jnp.tanh(gates[:, 2 * h:3 * h])
        o_g = jax.nn.sigmoid(gates[:, 3 * h:4 * h])
        cs = f_g * cs + i_g * g_g
        hs = o_g * jnp.tanh(cs)
    return hs @ params["W2"].T + params["b2"]


def init_params(key, input_size, hidden_size, output_size):
    ks = jax.random.split(key, 10)
    u = lambda k, shape, scale: jax.random.uniform(k, shape, jnp.float32,
                                                   -scale, scale)
    s1 = 1.0 / jnp.sqrt(input_size)
    sh = 1.0 / jnp.sqrt(hidden_size)
    return {
        "W1": u(ks[0], (hidden_size, input_size), s1),
        "b1": u(ks[1], (hidden_size,), s1),
        "Wa": u(ks[2], (1, hidden_size), sh),
        "ba": u(ks[3], (1,), sh),
        # NOTE: self.batch_norm is defined in __init__ but unused in forward.
        "W_ih": u(ks[4], (4 * hidden_size, hidden_size), sh),
        "W_hh": u(ks[5], (4 * hidden_size, hidden_size), sh),
        "b_ih": u(ks[6], (4 * hidden_size,), sh),
        "b_hh": u(ks[7], (4 * hidden_size,), sh),
        "W2": u(ks[8], (output_size, hidden_size), sh),
        "b2": u(ks[9], (output_size,), sh),
    }


if __name__ == "__main__":
    # B=8 keeps per-timestep G_in slices sublane-aligned; H=128 (module
    # default) makes every gate slice a full 128-lane vreg column.
    B, T, D, H = 8, 8, 16, 128
    O = D  # output_size defaults to input_size

    key = jax.random.PRNGKey(0)
    k_x, k_p = jax.random.split(key)
    x0 = jax.random.normal(k_x, (B, T, D), jnp.float32)
    params = init_params(k_p, D, H, O)

    out = model_forward(x0, params)
    out = jax.block_until_ready(out)

    # Reference in full f32 matmul precision so it matches the kernel's
    # f32-accurate MXU path.
    with jax.default_matmul_precision("highest"):
        ref = reference_forward(x0, params)

    assert out.shape == (B, O), out.shape
    max_err = float(jnp.max(jnp.abs(out - ref)))
    assert jnp.allclose(out, ref, atol=1e-4, rtol=1e-4), max_err

    print("KERNEL_OK")
</pallas_src>

<mosaic_0001>
module attributes {stable_mosaic.version = 11 : i64} {
  func.func @_fused_lstm_kernel(%arg0: i32, %arg1: memref<64x16xf32, #tpu.memory_space<vmem>>, %arg2: memref<16x128xf32, #tpu.memory_space<vmem>>, %arg3: memref<1x128xf32, #tpu.memory_space<vmem>>, %arg4: memref<1x128xf32, #tpu.memory_space<vmem>>, %arg5: memref<1xf32, #tpu.memory_space<smem>>, %arg6: memref<128x512xf32, #tpu.memory_space<vmem>>, %arg7: memref<128x512xf32, #tpu.memory_space<vmem>>, %arg8: memref<1x512xf32, #tpu.memory_space<vmem>>, %arg9: memref<128x16xf32, #tpu.memory_space<vmem>>, %arg10: memref<1x16xf32, #tpu.memory_space<vmem>>, %arg11: memref<8x16xf32, #tpu.memory_space<vmem>>, %arg12: memref<64x512xf32, #tpu.memory_space<vmem>>) attributes {dimension_semantics = [#tpu.dimension_semantics<arbitrary>], iteration_bounds = array<i64: 1>, scalar_prefetch = 0 : i64, scratch_operands = 1 : i64, tpu.core_type = #tpu.core_type<tc>, window_params = [{pipeline_mode = #tpu.pipeline_mode<synchronous>, transform_indices = @transform_0, window_bounds = array<i64: 64, 16>}, {pipeline_mode = #tpu.pipeline_mode<synchronous>, transform_indices = @transform_1, window_bounds = array<i64: 16, 128>}, {pipeline_mode = #tpu.pipeline_mode<synchronous>, transform_indices = @transform_2, window_bounds = array<i64: 1, 128>}, {pipeline_mode = #tpu.pipeline_mode<synchronous>, transform_indices = @transform_3, window_bounds = array<i64: 1, 128>}, {transform_indices = @transform_4, window_bounds = array<i64: 1>}, {pipeline_mode = #tpu.pipeline_mode<synchronous>, transform_indices = @transform_5, window_bounds = array<i64: 128, 512>}, {pipeline_mode = #tpu.pipeline_mode<synchronous>, transform_indices = @transform_6, window_bounds = array<i64: 128, 512>}, {pipeline_mode = #tpu.pipeline_mode<synchronous>, transform_indices = @transform_7, window_bounds = array<i64: 1, 512>}, {pipeline_mode = #tpu.pipeline_mode<synchronous>, transform_indices = @transform_8, window_bounds = array<i64: 128, 16>}, {pipeline_mode = #tpu.pipeline_mode<synchronous>, transform_indices = @transform_9, window_bounds = array<i64: 1, 16>}, {pipeline_mode = #tpu.pipeline_mode<synchronous>, transform_indices = @transform_10, window_bounds = array<i64: 8, 16>}]} {
    %c0 = arith.constant 0 : index
    %c0_0 = arith.constant 0 : index
    %0 = vector.load %arg1[%c0, %c0_0] : memref<64x16xf32, #tpu.memory_space<vmem>>, vector<64x16xf32>
    %c0_1 = arith.constant 0 : index
    %c0_2 = arith.constant 0 : index
    %1 = vector.load %arg2[%c0_1, %c0_2] : memref<16x128xf32, #tpu.memory_space<vmem>>, vector<16x128xf32>
    %cst = arith.constant dense<0.000000e+00> : vector<64x128xf32>
    %2 = tpu.matmul %0, %1, %cst {dimension_numbers = #tpu.dot_dimension_numbers<[1], [0], [0], [1], [0, 0, 1, 1], [], []>} : vector<64x16xf32>, vector<16x128xf32>, vector<64x128xf32> -> vector<64x128xf32>
    %c0_3 = arith.constant 0 : index
    %c0_4 = arith.constant 0 : index
    %3 = vector.load %arg3[%c0_3, %c0_4] : memref<1x128xf32, #tpu.memory_space<vmem>>, vector<1x128xf32>
    %4 = vector.broadcast %3 : vector<1x128xf32> to vector<64x128xf32>
    %5 = arith.addf %2, %4 : vector<64x128xf32>
    %cst_5 = arith.constant 0.000000e+00 : f32
    %6 = vector.broadcast %cst_5 : f32 to vector<64x128xf32>
    %7 = arith.cmpf oge, %5, %6 : vector<64x128xf32>
    %cst_6 = arith.constant 0.00999999977 : f32
    %8 = vector.broadcast %cst_6 : f32 to vector<64x128xf32>
    %9 = arith.mulf %8, %5 : vector<64x128xf32>
    %10 = arith.select %7, %5, %9 : vector<64x128xi1>, vector<64x128xf32>
    %c0_7 = arith.constant 0 : index
    %c0_8 = arith.constant 0 : index
    %11 = vector.load %arg4[%c0_7, %c0_8] : memref<1x128xf32, #tpu.memory_space<vmem>>, vector<1x128xf32>
    %12 = vector.broadcast %11 : vector<1x128xf32> to vector<64x128xf32>
    %13 = arith.mulf %10, %12 : vector<64x128xf32>
    %cst_9 = arith.constant dense<0.000000e+00> : vector<64xf32>
    %14 = vector.multi_reduction <add>, %13, %cst_9 [1] : vector<64x128xf32> to vector<64xf32>
    %15 = vector.shape_cast %14 : vector<64xf32> to vector<64x1xf32>
    %c0_10 = arith.constant 0 : index
    %16 = memref.load %arg5[%c0_10] : memref<1xf32, #tpu.memory_space<smem>>
    %17 = vector.broadcast %16 : f32 to vector<64x1xf32>
    %18 = arith.addf %15, %17 : vector<64x1xf32>
    %19 = vector.broadcast %18 : vector<64x1xf32> to vector<64x128xf32>
    %20 = arith.mulf %10, %19 : vector<64x128xf32>
    %c0_11 = arith.constant 0 : index
    %c0_12 = arith.constant 0 : index
    %21 = vector.load %arg6[%c0_11, %c0_12] : memref<128x512xf32, #tpu.memory_space<vmem>>, vector<128x512xf32>
    %cst_13 = arith.constant dense<0.000000e+00> : vector<64x512xf32>
    %22 = tpu.matmul %20, %21, %cst_13 {dimension_numbers = #tpu.dot_dimension_numbers<[1], [0], [0], [1], [0, 0, 1, 1], [], []>} : vector<64x128xf32>, vector<128x512xf32>, vector<64x512xf32> -> vector<64x512xf32>
    %c0_14 = arith.constant 0 : index
    %c0_15 = arith.constant 0 : index
    %23 = vector.load %arg8[%c0_14, %c0_15] : memref<1x512xf32, #tpu.memory_space<vmem>>, vector<1x512xf32>
    %24 = vector.broadcast %23 : vector<1x512xf32> to vector<64x512xf32>
    %25 = arith.addf %22, %24 : vector<64x512xf32>
    %c0_16 = arith.constant 0 : index
    %c0_17 = arith.constant 0 : index
    %26 = vector.load %arg12[%c0_16, %c0_17] : memref<64x512xf32, #tpu.memory_space<vmem>>, vector<64x512xf32>
    tpu.vector_store %arg12[%c0_16, %c0_17], %25 {strides = array<i32>} : memref<64x512xf32, #tpu.memory_space<vmem>>, vector<64x512xf32>,
    %c0_18 = arith.constant 0 : index
    %c0_19 = arith.constant 0 : index
    %27 = vector.load %arg7[%c0_18, %c0_19] : memref<128x512xf32, #tpu.memory_space<vmem>>, vector<128x512xf32>
    %cst_20 = arith.constant 0.000000e+00 : f32
    %28 = vector.broadcast %cst_20 : f32 to vector<8x128xf32>
    %cst_21 = arith.constant 0.000000e+00 : f32
    %29 = vector.broadcast %cst_21 : f32 to vector<8x128xf32>
    %c0_22 = arith.constant 0 : index
    %c0_23 = arith.constant 0 : index
    %30 = vector.load %arg12[%c0_22, %c0_23] : memref<64x512xf32, #tpu.memory_space<vmem>>, vector<8x512xf32>
    %cst_24 = arith.constant dense<0.000000e+00> : vector<8x512xf32>
    %31 = tpu.matmul %28, %27, %cst_24 {dimension_numbers = #tpu.dot_dimension_numbers<[1], [0], [0], [1], [0, 0, 1, 1], [], []>} : vector<8x128xf32>, vector<128x512xf32>, vector<8x512xf32> -> vector<8x512xf32>
    %32 = arith.addf %30, %31 : vector<8x512xf32>
    %33 = vector.extract_strided_slice %32 {offsets = [0, 0], sizes = [8, 128], strides = [1, 1]} : vector<8x512xf32> to vector<8x128xf32>
    %34 = arith.negf %33 : vector<8x128xf32>
    %35 = math.exp %34 : vector<8x128xf32>
    %cst_25 = arith.constant 1.000000e+00 : f32
    %36 = vector.broadcast %cst_25 : f32 to vector<8x128xf32>
    %37 = arith.addf %36, %35 : vector<8x128xf32>
    %38 = arith.divf %36, %37 : vector<8x128xf32>
    %39 = vector.extract_strided_slice %32 {offsets = [0, 128], sizes = [8, 128], strides = [1, 1]} : vector<8x512xf32> to vector<8x128xf32>
    %40 = arith.negf %39 : vector<8x128xf32>
    %41 = math.exp %40 : vector<8x128xf32>
    %cst_26 = arith.constant 1.000000e+00 : f32
    %42 = vector.broadcast %cst_26 : f32 to vector<8x128xf32>
    %43 = arith.addf %42, %41 : vector<8x128xf32>
    %44 = arith.divf %42, %43 : vector<8x128xf32>
    %45 = vector.extract_strided_slice %32 {offsets = [0, 256], sizes = [8, 128], strides = [1, 1]} : vector<8x512xf32> to vector<8x128xf32>
    %46 = math.tanh %45 : vector<8x128xf32>
    %47 = vector.extract_strided_slice %32 {offsets = [0, 384], sizes = [8, 128], strides = [1, 1]} : vector<8x512xf32> to vector<8x128xf32>
    %48 = arith.negf %47 : vector<8x128xf32>
    %49 = math.exp %48 : vector<8x128xf32>
    %cst_27 = arith.constant 1.000000e+00 : f32
    %50 = vector.broadcast %cst_27 : f32 to vector<8x128xf32>
    %51 = arith.addf %50, %49 : vector<8x128xf32>
    %52 = arith.divf %50, %51 : vector<8x128xf32>
    %53 = arith.mulf %44, %29 : vector<8x128xf32>
    %54 = arith.mulf %38, %46 : vector<8x128xf32>
    %55 = arith.addf %53, %54 : vector<8x128xf32>
    %56 = math.tanh %55 : vector<8x128xf32>
    %57 = arith.mulf %52, %56 : vector<8x128xf32>
    %c8 = arith.constant 8 : index
    %c0_28 = arith.constant 0 : index
    %58 = vector.load %arg12[%c8, %c0_28] : memref<64x512xf32, #tpu.memory_space<vmem>>, vector<8x512xf32>
    %cst_29 = arith.constant dense<0.000000e+00> : vector<8x512xf32>
    %59 = tpu.matmul %57, %27, %cst_29 {dimension_numbers = #tpu.dot_dimension_numbers<[1], [0], [0], [1], [0, 0, 1, 1], [], []>} : vector<8x128xf32>, vector<128x512xf32>, vector<8x512xf32> -> vector<8x512xf32>
    %60 = arith.addf %58, %59 : vector<8x512xf32>
    %61 = vector.extract_strided_slice %60 {offsets = [0, 0], sizes = [8, 128], strides = [1, 1]} : vector<8x512xf32> to vector<8x128xf32>
    %62 = arith.negf %61 : vector<8x128xf32>
    %63 = math.exp %62 : vector<8x128xf32>
    %cst_30 = arith.constant 1.000000e+00 : f32
    %64 = vector.broadcast %cst_30 : f32 to vector<8x128xf32>
    %65 = arith.addf %64, %63 : vector<8x128xf32>
    %66 = arith.divf %64, %65 : vector<8x128xf32>
    %67 = vector.extract_strided_slice %60 {offsets = [0, 128], sizes = [8, 128], strides = [1, 1]} : vector<8x512xf32> to vector<8x128xf32>
    %68 = arith.negf %67 : vector<8x128xf32>
    %69 = math.exp %68 : vector<8x128xf32>
    %cst_31 = arith.constant 1.000000e+00 : f32
    %70 = vector.broadcast %cst_31 : f32 to vector<8x128xf32>
    %71 = arith.addf %70, %69 : vector<8x128xf32>
    %72 = arith.divf %70, %71 : vector<8x128xf32>
    %73 = vector.extract_strided_slice %60 {offsets = [0, 256], sizes = [8, 128], strides = [1, 1]} : vector<8x512xf32> to vector<8x128xf32>
    %74 = math.tanh %73 : vector<8x128xf32>
    %75 = vector.extract_strided_slice %60 {offsets = [0, 384], sizes = [8, 128], strides = [1, 1]} : vector<8x512xf32> to vector<8x128xf32>
    %76 = arith.negf %75 : vector<8x128xf32>
    %77 = math.exp %76 : vector<8x128xf32>
    %cst_32 = arith.constant 1.000000e+00 : f32
    %78 = vector.broadcast %cst_32 : f32 to vector<8x128xf32>
    %79 = arith.addf %78, %77 : vector<8x128xf32>
    %80 = arith.divf %78, %79 : vector<8x128xf32>
    %81 = arith.mulf %72, %55 : vector<8x128xf32>
    %82 = arith.mulf %66, %74 : vector<8x128xf32>
    %83 = arith.addf %81, %82 : vector<8x128xf32>
    %84 = math.tanh %83 : vector<8x128xf32>
    %85 = arith.mulf %80, %84 : vector<8x128xf32>
    %c16 = arith.constant 16 : index
    %c0_33 = arith.constant 0 : index
    %86 = vector.load %arg12[%c16, %c0_33] : memref<64x512xf32, #tpu.memory_space<vmem>>, vector<8x512xf32>
    %cst_34 = arith.constant dense<0.000000e+00> : vector<8x512xf32>
    %87 = tpu.matmul %85, %27, %cst_34 {dimension_numbers = #tpu.dot_dimension_numbers<[1], [0], [0], [1], [0, 0, 1, 1], [], []>} : vector<8x128xf32>, vector<128x512xf32>, vector<8x512xf32> -> vector<8x512xf32>
    %88 = arith.addf %86, %87 : vector<8x512xf32>
    %89 = vector.extract_strided_slice %88 {offsets = [0, 0], sizes = [8, 128], strides = [1, 1]} : vector<8x512xf32> to vector<8x128xf32>
    %90 = arith.negf %89 : vector<8x128xf32>
    %91 = math.exp %90 : vector<8x128xf32>
    %cst_35 = arith.constant 1.000000e+00 : f32
    %92 = vector.broadcast %cst_35 : f32 to vector<8x128xf32>
    %93 = arith.addf %92, %91 : vector<8x128xf32>
    %94 = arith.divf %92, %93 : vector<8x128xf32>
    %95 = vector.extract_strided_slice %88 {offsets = [0, 128], sizes = [8, 128], strides = [1, 1]} : vector<8x512xf32> to vector<8x128xf32>
    %96 = arith.negf %95 : vector<8x128xf32>
    %97 = math.exp %96 : vector<8x128xf32>
    %cst_36 = arith.constant 1.000000e+00 : f32
    %98 = vector.broadcast %cst_36 : f32 to vector<8x128xf32>
    %99 = arith.addf %98, %97 : vector<8x128xf32>
    %100 = arith.divf %98, %99 : vector<8x128xf32>
    %101 = vector.extract_strided_slice %88 {offsets = [0, 256], sizes = [8, 128], strides = [1, 1]} : vector<8x512xf32> to vector<8x128xf32>
    %102 = math.tanh %101 : vector<8x128xf32>
    %103 = vector.extract_strided_slice %88 {offsets = [0, 384], sizes = [8, 128], strides = [1, 1]} : vector<8x512xf32> to vector<8x128xf32>
    %104 = arith.negf %103 : vector<8x128xf32>
    %105 = math.exp %104 : vector<8x128xf32>
    %cst_37 = arith.constant 1.000000e+00 : f32
    %106 = vector.broadcast %cst_37 : f32 to vector<8x128xf32>
    %107 = arith.addf %106, %105 : vector<8x128xf32>
    %108 = arith.divf %106, %107 : vector<8x128xf32>
    %109 = arith.mulf %100, %83 : vector<8x128xf32>
    %110 = arith.mulf %94, %102 : vector<8x128xf32>
    %111 = arith.addf %109, %110 : vector<8x128xf32>
    %112 = math.tanh %111 : vector<8x128xf32>
    %113 = arith.mulf %108, %112 : vector<8x128xf32>
    %c24 = arith.constant 24 : index
    %c0_38 = arith.constant 0 : index
    %114 = vector.load %arg12[%c24, %c0_38] : memref<64x512xf32, #tpu.memory_space<vmem>>, vector<8x512xf32>
    %cst_39 = arith.constant dense<0.000000e+00> : vector<8x512xf32>
    %115 = tpu.matmul %113, %27, %cst_39 {dimension_numbers = #tpu.dot_dimension_numbers<[1], [0], [0], [1], [0, 0, 1, 1], [], []>} : vector<8x128xf32>, vector<128x512xf32>, vector<8x512xf32> -> vector<8x512xf32>
    %116 = arith.addf %114, %115 : vector<8x512xf32>
    %117 = vector.extract_strided_slice %116 {offsets = [0, 0], sizes = [8, 128], strides = [1, 1]} : vector<8x512xf32> to vector<8x128xf32>
    %118 = arith.negf %117 : vector<8x128xf32>
    %119 = math.exp %118 : vector<8x128xf32>
    %cst_40 = arith.constant 1.000000e+00 : f32
    %120 = vector.broadcast %cst_40 : f32 to vector<8x128xf32>
    %121 = arith.addf %120, %119 : vector<8x128xf32>
    %122 = arith.divf %120, %121 : vector<8x128xf32>
    %123 = vector.extract_strided_slice %116 {offsets = [0, 128], sizes = [8, 128], strides = [1, 1]} : vector<8x512xf32> to vector<8x128xf32>
    %124 = arith.negf %123 : vector<8x128xf32>
    %125 = math.exp %124 : vector<8x128xf32>
    %cst_41 = arith.constant 1.000000e+00 : f32
    %126 = vector.broadcast %cst_41 : f32 to vector<8x128xf32>
    %127 = arith.addf %126, %125 : vector<8x128xf32>
    %128 = arith.divf %126, %127 : vector<8x128xf32>
    %129 = vector.extract_strided_slice %116 {offsets = [0, 256], sizes = [8, 128], strides = [1, 1]} : vector<8x512xf32> to vector<8x128xf32>
    %130 = math.tanh %129 : vector<8x128xf32>
    %131 = vector.extract_strided_slice %116 {offsets = [0, 384], sizes = [8, 128], strides = [1, 1]} : vector<8x512xf32> to vector<8x128xf32>
    %132 = arith.negf %131 : vector<8x128xf32>
    %133 = math.exp %132 : vector<8x128xf32>
    %cst_42 = arith.constant 1.000000e+00 : f32
    %134 = vector.broadcast %cst_42 : f32 to vector<8x128xf32>
    %135 = arith.addf %134, %133 : vector<8x128xf32>
    %136 = arith.divf %134, %135 : vector<8x128xf32>
    %137 = arith.mulf %128, %111 : vector<8x128xf32>
    %138 = arith.mulf %122, %130 : vector<8x128xf32>
    %139 = arith.addf %137, %138 : vector<8x128xf32>
    %140 = math.tanh %139 : vector<8x128xf32>
    %141 = arith.mulf %136, %140 : vector<8x128xf32>
    %c32 = arith.constant 32 : index
    %c0_43 = arith.constant 0 : index
    %142 = vector.load %arg12[%c32, %c0_43] : memref<64x512xf32, #tpu.memory_space<vmem>>, vector<8x512xf32>
    %cst_44 = arith.constant dense<0.000000e+00> : vector<8x512xf32>
    %143 = tpu.matmul %141, %27, %cst_44 {dimension_numbers = #tpu.dot_dimension_numbers<[1], [0], [0], [1], [0, 0, 1, 1], [], []>} : vector<8x128xf32>, vector<128x512xf32>, vector<8x512xf32> -> vector<8x512xf32>
    %144 = arith.addf %142, %143 : vector<8x512xf32>
    %145 = vector.extract_strided_slice %144 {offsets = [0, 0], sizes = [8, 128], strides = [1, 1]} : vector<8x512xf32> to vector<8x128xf32>
    %146 = arith.negf %145 : vector<8x128xf32>
    %147 = math.exp %146 : vector<8x128xf32>
    %cst_45 = arith.constant 1.000000e+00 : f32
    %148 = vector.broadcast %cst_45 : f32 to vector<8x128xf32>
    %149 = arith.addf %148, %147 : vector<8x128xf32>
    %150 = arith.divf %148, %149 : vector<8x128xf32>
    %151 = vector.extract_strided_slice %144 {offsets = [0, 128], sizes = [8, 128], strides = [1, 1]} : vector<8x512xf32> to vector<8x128xf32>
    %152 = arith.negf %151 : vector<8x128xf32>
    %153 = math.exp %152 : vector<8x128xf32>
    %cst_46 = arith.constant 1.000000e+00 : f32
    %154 = vector.broadcast %cst_46 : f32 to vector<8x128xf32>
    %155 = arith.addf %154, %153 : vector<8x128xf32>
    %156 = arith.divf %154, %155 : vector<8x128xf32>
    %157 = vector.extract_strided_slice %144 {offsets = [0, 256], sizes = [8, 128], strides = [1, 1]} : vector<8x512xf32> to vector<8x128xf32>
    %158 = math.tanh %157 : vector<8x128xf32>
    %159 = vector.extract_strided_slice %144 {offsets = [0, 384], sizes = [8, 128], strides = [1, 1]} : vector<8x512xf32> to vector<8x128xf32>
    %160 = arith.negf %159 : vector<8x128xf32>
    %161 = math.exp %160 : vector<8x128xf32>
    %cst_47 = arith.constant 1.000000e+00 : f32
    %162 = vector.broadcast %cst_47 : f32 to vector<8x128xf32>
    %163 = arith.addf %162, %161 : vector<8x128xf32>
    %164 = arith.divf %162, %163 : vector<8x128xf32>
    %165 = arith.mulf %156, %139 : vector<8x128xf32>
    %166 = arith.mulf %150, %158 : vector<8x128xf32>
    %167 = arith.addf %165, %166 : vector<8x128xf32>
    %168 = math.tanh %167 : vector<8x128xf32>
    %169 = arith.mulf %164, %168 : vector<8x128xf32>
    %c40 = arith.constant 40 : index
    %c0_48 = arith.constant 0 : index
    %170 = vector.load %arg12[%c40, %c0_48] : memref<64x512xf32, #tpu.memory_space<vmem>>, vector<8x512xf32>
    %cst_49 = arith.constant dense<0.000000e+00> : vector<8x512xf32>
    %171 = tpu.matmul %169, %27, %cst_49 {dimension_numbers = #tpu.dot_dimension_numbers<[1], [0], [0], [1], [0, 0, 1, 1], [], []>} : vector<8x128xf32>, vector<128x512xf32>, vector<8x512xf32> -> vector<8x512xf32>
    %172 = arith.addf %170, %171 : vector<8x512xf32>
    %173 = vector.extract_strided_slice %172 {offsets = [0, 0], sizes = [8, 128], strides = [1, 1]} : vector<8x512xf32> to vector<8x128xf32>
    %174 = arith.negf %173 : vector<8x128xf32>
    %175 = math.exp %174 : vector<8x128xf32>
    %cst_50 = arith.constant 1.000000e+00 : f32
    %176 = vector.broadcast %cst_50 : f32 to vector<8x128xf32>
    %177 = arith.addf %176, %175 : vector<8x128xf32>
    %178 = arith.divf %176, %177 : vector<8x128xf32>
    %179 = vector.extract_strided_slice %172 {offsets = [0, 128], sizes = [8, 128], strides = [1, 1]} : vector<8x512xf32> to vector<8x128xf32>
    %180 = arith.negf %179 : vector<8x128xf32>
    %181 = math.exp %180 : vector<8x128xf32>
    %cst_51 = arith.constant 1.000000e+00 : f32
    %182 = vector.broadcast %cst_51 : f32 to vector<8x128xf32>
    %183 = arith.addf %182, %181 : vector<8x128xf32>
    %184 = arith.divf %182, %183 : vector<8x128xf32>
    %185 = vector.extract_strided_slice %172 {offsets = [0, 256], sizes = [8, 128], strides = [1, 1]} : vector<8x512xf32> to vector<8x128xf32>
    %186 = math.tanh %185 : vector<8x128xf32>
    %187 = vector.extract_strided_slice %172 {offsets = [0, 384], sizes = [8, 128], strides = [1, 1]} : vector<8x512xf32> to vector<8x128xf32>
    %188 = arith.negf %187 : vector<8x128xf32>
    %189 = math.exp %188 : vector<8x128xf32>
    %cst_52 = arith.constant 1.000000e+00 : f32
    %190 = vector.broadcast %cst_52 : f32 to vector<8x128xf32>
    %191 = arith.addf %190, %189 : vector<8x128xf32>
    %192 = arith.divf %190, %191 : vector<8x128xf32>
    %193 = arith.mulf %184, %167 : vector<8x128xf32>
    %194 = arith.mulf %178, %186 : vector<8x128xf32>
    %195 = arith.addf %193, %194 : vector<8x128xf32>
    %196 = math.tanh %195 : vector<8x128xf32>
    %197 = arith.mulf %192, %196 : vector<8x128xf32>
    %c48 = arith.constant 48 : index
    %c0_53 = arith.constant 0 : index
    %198 = vector.load %arg12[%c48, %c0_53] : memref<64x512xf32, #tpu.memory_space<vmem>>, vector<8x512xf32>
    %cst_54 = arith.constant dense<0.000000e+00> : vector<8x512xf32>
    %199 = tpu.matmul %197, %27, %cst_54 {dimension_numbers = #tpu.dot_dimension_numbers<[1], [0], [0], [1], [0, 0, 1, 1], [], []>} : vector<8x128xf32>, vector<128x512xf32>, vector<8x512xf32> -> vector<8x512xf32>
    %200 = arith.addf %198, %199 : vector<8x512xf32>
    %201 = vector.extract_strided_slice %200 {offsets = [0, 0], sizes = [8, 128], strides = [1, 1]} : vector<8x512xf32> to vector<8x128xf32>
    %202 = arith.negf %201 : vector<8x128xf32>
    %203 = math.exp %202 : vector<8x128xf32>
    %cst_55 = arith.constant 1.000000e+00 : f32
    %204 = vector.broadcast %cst_55 : f32 to vector<8x128xf32>
    %205 = arith.addf %204, %203 : vector<8x128xf32>
    %206 = arith.divf %204, %205 : vector<8x128xf32>
    %207 = vector.extract_strided_slice %200 {offsets = [0, 128], sizes = [8, 128], strides = [1, 1]} : vector<8x512xf32> to vector<8x128xf32>
    %208 = arith.negf %207 : vector<8x128xf32>
    %209 = math.exp %208 : vector<8x128xf32>
    %cst_56 = arith.constant 1.000000e+00 : f32
    %210 = vector.broadcast %cst_56 : f32 to vector<8x128xf32>
    %211 = arith.addf %210, %209 : vector<8x128xf32>
    %212 = arith.divf %210, %211 : vector<8x128xf32>
    %213 = vector.extract_strided_slice %200 {offsets = [0, 256], sizes = [8, 128], strides = [1, 1]} : vector<8x512xf32> to vector<8x128xf32>
    %214 = math.tanh %213 : vector<8x128xf32>
    %215 = vector.extract_strided_slice %200 {offsets = [0, 384], sizes = [8, 128], strides = [1, 1]} : vector<8x512xf32> to vector<8x128xf32>
    %216 = arith.negf %215 : vector<8x128xf32>
    %217 = math.exp %216 : vector<8x128xf32>
    %cst_57 = arith.constant 1.000000e+00 : f32
    %218 = vector.broadcast %cst_57 : f32 to vector<8x128xf32>
    %219 = arith.addf %218, %217 : vector<8x128xf32>
    %220 = arith.divf %218, %219 : vector<8x128xf32>
    %221 = arith.mulf %212, %195 : vector<8x128xf32>
    %222 = arith.mulf %206, %214 : vector<8x128xf32>
    %223 = arith.addf %221, %222 : vector<8x128xf32>
    %224 = math.tanh %223 : vector<8x128xf32>
    %225 = arith.mulf %220, %224 : vector<8x128xf32>
    %c56 = arith.constant 56 : index
    %c0_58 = arith.constant 0 : index
    %226 = vector.load %arg12[%c56, %c0_58] : memref<64x512xf32, #tpu.memory_space<vmem>>, vector<8x512xf32>
    %cst_59 = arith.constant dense<0.000000e+00> : vector<8x512xf32>
    %227 = tpu.matmul %225, %27, %cst_59 {dimension_numbers = #tpu.dot_dimension_numbers<[1], [0], [0], [1], [0, 0, 1, 1], [], []>} : vector<8x128xf32>, vector<128x512xf32>, vector<8x512xf32> -> vector<8x512xf32>
    %228 = arith.addf %226, %227 : vector<8x512xf32>
    %229 = vector.extract_strided_slice %228 {offsets = [0, 0], sizes = [8, 128], strides = [1, 1]} : vector<8x512xf32> to vector<8x128xf32>
    %230 = arith.negf %229 : vector<8x128xf32>
    %231 = math.exp %230 : vector<8x128xf32>
    %cst_60 = arith.constant 1.000000e+00 : f32
    %232 = vector.broadcast %cst_60 : f32 to vector<8x128xf32>
    %233 = arith.addf %232, %231 : vector<8x128xf32>
    %234 = arith.divf %232, %233 : vector<8x128xf32>
    %235 = vector.extract_strided_slice %228 {offsets = [0, 128], sizes = [8, 128], strides = [1, 1]} : vector<8x512xf32> to vector<8x128xf32>
    %236 = arith.negf %235 : vector<8x128xf32>
    %237 = math.exp %236 : vector<8x128xf32>
    %cst_61 = arith.constant 1.000000e+00 : f32
    %238 = vector.broadcast %cst_61 : f32 to vector<8x128xf32>
    %239 = arith.addf %238, %237 : vector<8x128xf32>
    %240 = arith.divf %238, %239 : vector<8x128xf32>
    %241 = vector.extract_strided_slice %228 {offsets = [0, 256], sizes = [8, 128], strides = [1, 1]} : vector<8x512xf32> to vector<8x128xf32>
    %242 = math.tanh %241 : vector<8x128xf32>
    %243 = vector.extract_strided_slice %228 {offsets = [0, 384], sizes = [8, 128], strides = [1, 1]} : vector<8x512xf32> to vector<8x128xf32>
    %244 = arith.negf %243 : vector<8x128xf32>
    %245 = math.exp %244 : vector<8x128xf32>
    %cst_62 = arith.constant 1.000000e+00 : f32
    %246 = vector.broadcast %cst_62 : f32 to vector<8x128xf32>
    %247 = arith.addf %246, %245 : vector<8x128xf32>
    %248 = arith.divf %246, %247 : vector<8x128xf32>
    %249 = arith.mulf %240, %223 : vector<8x128xf32>
    %250 = arith.mulf %234, %242 : vector<8x128xf32>
    %251 = arith.addf %249, %250 : vector<8x128xf32>
    %252 = math.tanh %251 : vector<8x128xf32>
    %253 = arith.mulf %248, %252 : vector<8x128xf32>
    %c0_63 = arith.constant 0 : index
    %c0_64 = arith.constant 0 : index
    %254 = vector.load %arg9[%c0_63, %c0_64] : memref<128x16xf32, #tpu.memory_space<vmem>>, vector<128x16xf32>
    %cst_65 = arith.constant dense<0.000000e+00> : vector<8x16xf32>
    %255 = tpu.matmul %253, %254, %cst_65 {dimension_numbers = #tpu.dot_dimension_numbers<[1], [0], [0], [1], [0, 0, 1, 1], [], []>} : vector<8x128xf32>, vector<128x16xf32>, vector<8x16xf32> -> vector<8x16xf32>
    %c0_66 = arith.constant 0 : index
    %c0_67 = arith.constant 0 : index
    %256 = vector.load %arg10[%c0_66, %c0_67] : memref<1x16xf32, #tpu.memory_space<vmem>>, vector<1x16xf32>
    %257 = vector.broadcast %256 : vector<1x16xf32> to vector<8x16xf32>
    %258 = arith.addf %255, %257 : vector<8x16xf32>
    %c0_68 = arith.constant 0 : index
    %c0_69 = arith.constant 0 : index
    %259 = vector.load %arg11[%c0_68, %c0_69] : memref<8x16xf32, #tpu.memory_space<vmem>>, vector<8x16xf32>
    tpu.vector_store %arg11[%c0_68, %c0_69], %258 {strides = array<i32>} : memref<8x16xf32, #tpu.memory_space<vmem>>, vector<8x16xf32>,
    return
  }
  func.func @transform_0(%arg0: i32) -> (i32, i32) {
    %c0_i32 = arith.constant 0 : i32
    %c0_i32_0 = arith.constant 0 : i32
    %c0_i32_1 = arith.constant 0 : i32
    return %c0_i32, %c0_i32_0 : i32, i32
  }
  func.func @transform_1(%arg0: i32) -> (i32, i32) {
    %c0_i32 = arith.constant 0 : i32
    %c0_i32_0 = arith.constant 0 : i32
    %c0_i32_1 = arith.constant 0 : i32
    return %c0_i32, %c0_i32_0 : i32, i32
  }
  func.func @transform_2(%arg0: i32) -> (i32, i32) {
    %c0_i32 = arith.constant 0 : i32
    %c0_i32_0 = arith.constant 0 : i32
    %c0_i32_1 = arith.constant 0 : i32
    return %c0_i32, %c0_i32_0 : i32, i32
  }
  func.func @transform_3(%arg0: i32) -> (i32, i32) {
    %c0_i32 = arith.constant 0 : i32
    %c0_i32_0 = arith.constant 0 : i32
    %c0_i32_1 = arith.constant 0 : i32
    return %c0_i32, %c0_i32_0 : i32, i32
  }
  func.func @transform_4(%arg0: i32) -> i32 {
    %c0_i32 = arith.constant 0 : i32
    %c0_i32_0 = arith.constant 0 : i32
    return %c0_i32 : i32
  }
  func.func @transform_5(%arg0: i32) -> (i32, i32) {
    %c0_i32 = arith.constant 0 : i32
    %c0_i32_0 = arith.constant 0 : i32
    %c0_i32_1 = arith.constant 0 : i32
    return %c0_i32, %c0_i32_0 : i32, i32
  }
  func.func @transform_6(%arg0: i32) -> (i32, i32) {
    %c0_i32 = arith.constant 0 : i32
    %c0_i32_0 = arith.constant 0 : i32
    %c0_i32_1 = arith.constant 0 : i32
    return %c0_i32, %c0_i32_0 : i32, i32
  }
  func.func @transform_7(%arg0: i32) -> (i32, i32) {
    %c0_i32 = arith.constant 0 : i32
    %c0_i32_0 = arith.constant 0 : i32
    %c0_i32_1 = arith.constant 0 : i32
    return %c0_i32, %c0_i32_0 : i32, i32
  }
  func.func @transform_8(%arg0: i32) -> (i32, i32) {
    %c0_i32 = arith.constant 0 : i32
    %c0_i32_0 = arith.constant 0 : i32
    %c0_i32_1 = arith.constant 0 : i32
    return %c0_i32, %c0_i32_0 : i32, i32
  }
  func.func @transform_9(%arg0: i32) -> (i32, i32) {
    %c0_i32 = arith.constant 0 : i32
    %c0_i32_0 = arith.constant 0 : i32
    %c0_i32_1 = arith.constant 0 : i32
    return %c0_i32, %c0_i32_0 : i32, i32
  }
  func.func @transform_10(%arg0: i32) -> (i32, i32) {
    %c0_i32 = arith.constant 0 : i32
    %c0_i32_0 = arith.constant 0 : i32
    %c0_i32_1 = arith.constant 0 : i32
    return %c0_i32, %c0_i32_0 : i32, i32
  }
}

</mosaic_0001>

<bundles_post_ra>
// kernel: model_forward.1
= control target key start
LH: loop header
LB: loop body
LE: loop exit
PB: predicated region body
PF: predicated region fallthrough
CT: control target
= control target key end

     0   :  { %vm54_vm0 = vcmask 130048   ;;  %s4239_s0 = inlined_call_operand.vmem [shape: f32[64,16], index: 0, kind: input, shape index: {}]   ;;  %s4240_s1 = inlined_call_operand.vmem [shape: f32[16,128], index: 1, kind: input, shape index: {}]   ;;  %s4241_s2 = inlined_call_operand.vmem [shape: f32[1,128], index: 2, kind: input, shape index: {}]   ;;  %s4242_s3 = inlined_call_operand.vmem [shape: f32[1,128], index: 3, kind: input, shape index: {}]   ;;  %s4243_s4 = inlined_call_operand.<no memory space> [shape: f32[1], index: 4, kind: input, shape index: {}]   ;;  %s4244_s5 = inlined_call_operand.vmem [shape: f32[128,512], index: 5, kind: input, shape index: {}]   ;;  %s4245_s6 = inlined_call_operand.vmem [shape: f32[128,512], index: 6, kind: input, shape index: {}]   ;;  %s4246_s7 = inlined_call_operand.vmem [shape: f32[1,512], index: 7, kind: input, shape index: {}]   ;;  %s4247_s8 = inlined_call_operand.vmem [shape: f32[128,16], index: 8, kind: input, shape index: {}]   ;;  %s4248_s9 = inlined_call_operand.vmem [shape: f32[1,16], index: 9, kind: input, shape index: {}]   ;;  %s4249_s10 = inlined_call_operand.hbm [shape: f32[8,16], index: 10, kind: output, shape index: {}]  }
   0x1   :  { %v46_v0 = vld [vmem:[%s4240_s1 + $0x8] sm:$0xff]  ;;  %v45_v1 = vld [vmem:[%s4240_s1] sm:$0xff]  ;;  %v39_v4 = vld [vmem:[%s4239_s0 + $0x10] sm:$0xff] }
   0x2   :  { %v37_v2 = vld [vmem:[%s4239_s0] sm:$0xff]  ;;  %2227 = vmatprep.subr.mxu0 %v46_v0  ;;  %v38_v3 = vld [vmem:[%s4239_s0 + $0x8] sm:$0xff] }
   0x3   :  { %2231 = vmatprep.mubr.msk.f32.mxu0 %vm54_vm0, %v37_v2  ;;  %2228 = vmatpush3.msra.mxu0 %v46_v0 }
   0x4   :  { %2229 = vmatprep.subr.mxu0 %v45_v1 }
   0x5   :  { %16 = vsyncpa [#allocation5], 0  ;;  %2230 = vmatpush3.msra.mxu0 %v45_v1  ;;  %v40_v5 = vld [vmem:[%s4239_s0 + $0x18] sm:$0xff]  ;;  %v41_v6 = vld [vmem:[%s4239_s0 + $0x20] sm:$0xff]  ;;  %vm2496_vm9 = vmmov 0   ;;  %s2497_s29 = smov [#allocation4]  }
   0x6   :  { %2232 = vmatmul.mubr.msk.f32.vlgmr.msra.gmra.mxu0 %vm54_vm0, %v38_v3  ;;  %v42_v7 = vld [vmem:[%s4239_s0 + $0x28] sm:$0xff]  ;;  %v43_v8 = vld [vmem:[%s4239_s0 + $0x30] sm:$0xff]  ;;  %v44_v9 = vld [vmem:[%s4239_s0 + $0x38] sm:$0xff]  ;;  %s2157_s30 = sshll.u32 %s2497_s29, 4  ;;  %s2158_s30 = int_to_ptr.vmem [resolvable:$true] %s2157_s30 }
   0x7   :  { %2234 = vmatprep.mubr.msk.f32.mxu0 %vm54_vm0, %v39_v4  ;;  %v318_v10 = vld [vmem:[%s4244_s5 + $0x1e8] sm:$0xff]  ;;  %v317_v11 = vld [vmem:[%s4244_s5 + $0x1e0] sm:$0xff]  ;;  %v320_v12 = vld [vmem:[%s4244_s5 + $0x1f8] sm:$0xff]  ;;  %s2473_s11 = scalar_lea.vmem %s2158_s30, 128  ;;  %p2478_p1 = scmp.lt.s32.totalorder %s2158_s30, %s2158_s30 }
   0x8   :  { %343 = vmatprep.subr.mxu1 %v318_v10  ;;  %456 = vmatprep.subr.mxu0 %v320_v12  ;;  %v314_v13 = vld [vmem:[%s4244_s5 + $0x1c8] sm:$0xff]  ;;  %v319_v14 = vld [vmem:[%s4244_s5 + $0x1f0] sm:$0xff]  ;;  %v313_v15 = vld [vmem:[%s4244_s5 + $0x1c0] sm:$0xff]  ;;  %p2474_p0 = scmp.ne.s32.totalorder %s2158_s30, %s2473_s11  ;;  %p2479_p2 = scmp.lt.s32.totalorder %s2473_s11, %s2473_s11 }
   0x9   :  { %344 = vmatpush1.msra.mxu1 %v317_v11  ;;  %457 = vmatpush1.msra.mxu0 %v319_v14  ;;  %v316_v16 = vld [vmem:[%s4244_s5 + $0x1d8] sm:$0xff]  ;;  %v310_v17 = vld [vmem:[%s4244_s5 + $0x1a8] sm:$0xff]  ;;  %v315_v18 = vld [vmem:[%s4244_s5 + $0x1d0] sm:$0xff] }
   0xa   :  { %2235 = vmatmul.mubr.msk.f32.gmra.mxu0 %vm54_vm0, %v40_v5  ;;  %345 = vmatprep.subr.mxu1 %v314_v13  ;;  %v309_v19 = vld [vmem:[%s4244_s5 + $0x1a0] sm:$0xff]  ;;  %v312_v20 = vld [vmem:[%s4244_s5 + $0x1b8] sm:$0xff]  ;;  %v306_v21 = vld [vmem:[%s4244_s5 + $0x188] sm:$0xff]  ;;  %p2480_p3 = por %p2479_p2, %p2478_p1 }
   0xb   :  { %2237 = vmatprep.mubr.msk.f32.mxu0 %vm54_vm0, %v41_v6  ;;  %458 = vmatprep.subr.mxu0 %v316_v16  ;;  %v311_v22 = vld [vmem:[%s4244_s5 + $0x1b0] sm:$0xff]  ;;  %v308_v23 = vld [vmem:[%s4244_s5 + $0x198] sm:$0xff]  ;;  %v305_v24 = vld [vmem:[%s4244_s5 + $0x180] sm:$0xff] }
   0xc   :  { %346 = vmatpush1.msra.mxu1 %v313_v15  ;;  %459 = vmatpush1.msra.mxu0 %v315_v18  ;;  %v307_v25 = vld [vmem:[%s4244_s5 + $0x190] sm:$0xff]  ;;  %v302_v26 = vld [vmem:[%s4244_s5 + $0x168] sm:$0xff]  ;;  %v304_v27 = vld [vmem:[%s4244_s5 + $0x178] sm:$0xff]  ;;  %p2481_p4 = pnand %p2480_p3, %p2474_p0 }
   0xd   :  { %347 = vmatprep.subr.mxu1 %v310_v17  ;;  %460 = vmatprep.subr.mxu0 %v312_v20  ;;  %v301_v28 = vld [vmem:[%s4244_s5 + $0x160] sm:$0xff]  ;;  %v303_v29 = vld [vmem:[%s4244_s5 + $0x170] sm:$0xff]  ;;  %v298_v30 = vld [vmem:[%s4244_s5 + $0x148] sm:$0xff] }
   0xe   :  { %2238 = vmatmul.mubr.msk.f32.gmra.mxu0 %vm54_vm0, %v42_v7  ;;  %348 = vmatpush1.msra.mxu1 %v309_v19  ;;  %v300_v31 = vld [vmem:[%s4244_s5 + $0x158] sm:$0xff]  ;;  %v297_v32 = vld [vmem:[%s4244_s5 + $0x140] sm:$0xff]  ;;  %v299_v33 = vld [vmem:[%s4244_s5 + $0x150] sm:$0xff] }
   0xf   :  { %2240 = vmatprep.mubr.msk.f32.mxu0 %vm54_vm0, %v43_v8  ;;  %461 = vmatpush1.msra.mxu0 %v311_v22  ;;  %v294_v34 = vld [vmem:[%s4244_s5 + $0x128] sm:$0xff]  ;;  %v296_v35 = vld [vmem:[%s4244_s5 + $0x138] sm:$0xff]  ;;  %v293_v36 = vld [vmem:[%s4244_s5 + $0x120] sm:$0xff] }
  0x10   :  { %349 = vmatprep.subr.mxu1 %v306_v21  ;;  %462 = vmatprep.subr.mxu0 %v308_v23  ;;  %v295_v37 = vld [vmem:[%s4244_s5 + $0x130] sm:$0xff]  ;;  %v290_v38 = vld [vmem:[%s4244_s5 + $0x108] sm:$0xff]  ;;  %v292_v39 = vld [vmem:[%s4244_s5 + $0x118] sm:$0xff] }
  0x11   :  { %350 = vmatpush1.msra.mxu1 %v305_v24  ;;  %463 = vmatpush1.msra.mxu0 %v307_v25  ;;  %v289_v40 = vld [vmem:[%s4244_s5 + $0x100] sm:$0xff]  ;;  %v291_v41 = vld [vmem:[%s4244_s5 + $0x110] sm:$0xff]  ;;  %v286_v42 = vld [vmem:[%s4244_s5 + $0xe8] sm:$0xff] }
  0x12   :  { %2241 = vmatmul.mubr.msk.f32.gmra.mxu0 %vm54_vm0, %v44_v9  ;;  %351 = vmatprep.subr.mxu1 %v302_v26  ;;  %v288_v43 = vld [vmem:[%s4244_s5 + $0xf8] sm:$0xff]  ;;  %v285_v44 = vld [vmem:[%s4244_s5 + $0xe0] sm:$0xff]  ;;  %v287_v45 = vld [vmem:[%s4244_s5 + $0xf0] sm:$0xff] }
  0x13   :  { %464 = vmatprep.subr.mxu0 %v304_v27  ;;  %352 = vmatpush1.msra.mxu1 %v301_v28  ;;  %v282_v46 = vld [vmem:[%s4244_s5 + $0xc8] sm:$0xff]  ;;  %v284_v47 = vld [vmem:[%s4244_s5 + $0xd8] sm:$0xff]  ;;  %v281_v48 = vld [vmem:[%s4244_s5 + $0xc0] sm:$0xff] }
  0x14   :  { %465 = vmatpush1.msra.mxu0 %v303_v29  ;;  %353 = vmatprep.subr.mxu1 %v298_v30  ;;  %v283_v49 = vld [vmem:[%s4244_s5 + $0xd0] sm:$0xff]  ;;  %v278_v50 = vld [vmem:[%s4244_s5 + $0xa8] sm:$0xff]  ;;  %v280_v51 = vld [vmem:[%s4244_s5 + $0xb8] sm:$0xff] }
  0x15   :  { %466 = vmatprep.subr.mxu0 %v300_v31  ;;  %354 = vmatpush1.msra.mxu1 %v297_v32  ;;  %v277_v52 = vld [vmem:[%s4244_s5 + $0xa0] sm:$0xff]  ;;  %v279_v53 = vld [vmem:[%s4244_s5 + $0xb0] sm:$0xff]  ;;  %v274_v54 = vld [vmem:[%s4244_s5 + $0x88] sm:$0xff] }
  0x16   :  { %467 = vmatpush1.msra.mxu0 %v299_v33  ;;  %355 = vmatprep.subr.mxu1 %v294_v34  ;;  %v276_v55 = vld [vmem:[%s4244_s5 + $0x98] sm:$0xff]  ;;  %v273_v56 = vld [vmem:[%s4244_s5 + $0x80] sm:$0xff]  ;;  %v275_v57 = vld [vmem:[%s4244_s5 + $0x90] sm:$0xff] }
  0x17   :  { %468 = vmatprep.subr.mxu0 %v296_v35  ;;  %356 = vmatpush1.msra.mxu1 %v293_v36  ;;  %v270_v58 = vld [vmem:[%s4244_s5 + $0x68] sm:$0xff]  ;;  %v272_v59 = vld [vmem:[%s4244_s5 + $0x78] sm:$0xff]  ;;  %v269_v60 = vld [vmem:[%s4244_s5 + $0x60] sm:$0xff] }
  0x18   :  { %469 = vmatpush1.msra.mxu0 %v295_v37  ;;  %357 = vmatprep.subr.mxu1 %v290_v38  ;;  %v271_v61 = vld [vmem:[%s4244_s5 + $0x70] sm:$0xff]  ;;  %v266_v62 = vld [vmem:[%s4244_s5 + $0x48] sm:$0xff]  ;;  %v268_v63 = vld [vmem:[%s4244_s5 + $0x58] sm:$0xff] }
  0x19   :  { %470 = vmatprep.subr.mxu0 %v292_v39  ;;  %358 = vmatpush1.msra.mxu1 %v289_v40  ;;  %v265_v0 = vld [vmem:[%s4244_s5 + $0x40] sm:$0xff]  ;;  %v267_v1 = vld [vmem:[%s4244_s5 + $0x50] sm:$0xff]  ;;  %v262_v2 = vld [vmem:[%s4244_s5 + $0x28] sm:$0xff] }
  0x1a   :  { %471 = vmatpush1.msra.mxu0 %v291_v41  ;;  %359 = vmatprep.subr.mxu1 %v286_v42  ;;  %v2165_v3 = vld [vmem:[%s4241_s2] ss:$0 sm:$0xff] }
  0x1b   :  { %472 = vmatprep.subr.mxu0 %v288_v43  ;;  %360 = vmatpush1.msra.mxu1 %v285_v44  ;;  %v2174_v15 = vld [vmem:[%s4242_s3] ss:$0 sm:$0xff]  ;;  %v264_v43 = vld [vmem:[%s4244_s5 + $0x38] sm:$0xff] }
  0x1c   :  { %473 = vmatpush1.msra.mxu0 %v287_v45  ;;  %361 = vmatprep.subr.mxu1 %v282_v46  ;;  %v261_v45 = vld [vmem:[%s4244_s5 + $0x20] sm:$0xff]  ;;  %v263_v46 = vld [vmem:[%s4244_s5 + $0x30] sm:$0xff] }
  0x1d   :  { %474 = vmatprep.subr.mxu0 %v284_v47  ;;  %362 = vmatpush1.msra.mxu1 %v281_v48  ;;  %v258_v47 = vld [vmem:[%s4244_s5 + $0x8] sm:$0xff]  ;;  %v260_v48 = vld [vmem:[%s4244_s5 + $0x18] sm:$0xff] }
  0x1e   :  { %475 = vmatpush1.msra.mxu0 %v283_v49  ;;  %363 = vmatprep.subr.mxu1 %v278_v50  ;;  %v257_v50 = vld [vmem:[%s4244_s5] sm:$0xff] }
  0x1f   :  { %476 = vmatprep.subr.mxu0 %v280_v51  ;;  %364 = vmatpush1.msra.mxu1 %v277_v52  ;;  %v259_v51 = vld [vmem:[%s4244_s5 + $0x10] sm:$0xff]  ;;  %v2816_v52 = vld [vmem:[%s4245_s6 + $0x1e8] sm:$0xff] }
  0x20   :  { %477 = vmatpush1.msra.mxu0 %v279_v53  ;;  %365 = vmatprep.subr.mxu1 %v274_v54  ;;  %4338 = vst [vmem:[#allocation7_spill] sm:$0xff] %v2816_v52  ;;  %v4250_v53 = vmov 0.0   ;;  %v2822_v54 = vld [vmem:[%s4245_s6 + $0x1f8] sm:$0xff] }
  0x21   :  { %478 = vmatprep.subr.mxu0 %v276_v55  ;;  %366 = vmatpush1.msra.mxu1 %v273_v56  ;;  %4339 = vst [vmem:[#allocation8_spill] sm:$0xff] %v2822_v54  ;;  %v2830_v55 = vstv %s4243_s4 }
  0x22   :  { %479 = vmatpush1.msra.mxu0 %v275_v57  ;;  %367 = vmatprep.subr.mxu1 %v270_v58 }
  0x23   :  { %480 = vmatprep.subr.mxu0 %v272_v59  ;;  %368 = vmatpush1.msra.mxu1 %v269_v60  ;;  %v2837_v59 = vld [vmem:[%s4245_s6 + $0x1e0] sm:$0xff]  ;;  %v2842_v60 = vld [vmem:[%s4245_s6 + $0x1f0] sm:$0xff] }
  0x24   :  { %481 = vmatpush1.msra.mxu0 %v271_v61  ;;  %369 = vmatprep.subr.mxu1 %v266_v62  ;;  %v2847_v62 = vld [vmem:[%s4245_s6 + $0x1c8] sm:$0xff] }
  0x25   :  { %482 = vmatprep.subr.mxu0 %v268_v63  ;;  %370 = vmatpush1.msra.mxu1 %v265_v0  ;;  %v2852_v63 = vld [vmem:[%s4245_s6 + $0x1d8] sm:$0xff] }
  0x26   :  { %483 = vmatpush1.msra.mxu0 %v267_v1  ;;  %371 = vmatprep.subr.mxu1 %v262_v2  ;;  %v2858_v1 = vld [vmem:[%s4245_s6 + $0x1c0] sm:$0xff]  ;;  %v2865_v2 = vld [vmem:[%s4245_s6 + $0x1a8] sm:$0xff] }
  0x27   :  { %484 = vmatprep.subr.mxu0 %v264_v43  ;;  %372 = vmatpush1.msra.mxu1 %v261_v45  ;;  %v3036_v43 = vld [vmem:[%s4245_s6 + $0xe0] sm:$0xff] }
  0x28   :  { %485 = vmatpush1.msra.mxu0 %v263_v46  ;;  %373 = vmatprep.subr.mxu1 %v258_v47  ;;  %v3055_v46 = vld [vmem:[%s4245_s6 + $0xf0] sm:$0xff]  ;;  %v3060_v47 = vld [vmem:[%s4245_s6 + $0xc0] sm:$0xff] }
  0x29   :  { %486 = vmatprep.subr.mxu0 %v260_v48  ;;  %374 = vmatpush1.msra.mxu1 %v257_v50  ;;  %v3066_v48 = vld [vmem:[%s4245_s6 + $0xd8] sm:$0xff] }
  0x2a   :  { %407 = vmatprep.mubr.f32.mxu1 %v4250_v53  ;;  %487 = vmatpush1.msra.mxu0 %v259_v51  ;;  %v3080_v51 = vld [vmem:[%s4245_s6 + $0xd0] sm:$0xff] }
  0x2b   :  { %520 = vmatprep.mubr.f32.mxu0 %v4250_v53  ;;  %669 = vmatprep.subr.mxu1 %v2816_v52 }
  0x2c   :  { %740 = vmatprep.subr.mxu0 %v2822_v54 }
  0xc6   :  { %v2233_v4 = vpop.f32.mrf.mxu0 }
  0xc7   :  { %v151_v5 = vadd.f32 %v2233_v4, %v2165_v3 }
  0xc8   :  { %v145_v6 = vpop.f32.mrf.mxu0 }
  0xc9   :  { %v146_v7 = vadd.f32 %v2165_v3, %v145_v6  ;;  %v193_v8 = vmul.f32 0.01, %v151_v5  ;;  %vm185_vm2 = vcmp.ge.f32.partialorder %v151_v5, 0.0  ;;  %v2880_v6 = vld [vmem:[%s4245_s6 + $0x1a0] sm:$0xff] }
  0xca   :  { %v2236_v9 = vpop.f32.mrf.mxu0 }
  0xcb   :  { %v192_v10 = vmul.f32 0.01, %v146_v7  ;;  %v161_v11 = vadd.f32 %v2236_v9, %v2165_v3  ;;  %vm184_vm1 = vcmp.ge.f32.partialorder %v146_v7, 0.0  ;;  %v2771_v18 = vsel %vm185_vm2, %v151_v5, %v193_v8  ;;  %v2873_v5 = vld [vmem:[%s4245_s6 + $0x1d0] sm:$0xff]  ;;  %v2892_v8 = vld [vmem:[%s4245_s6 + $0x188] sm:$0xff] }
  0xcc   :  { %v155_v12 = vpop.f32.mrf.mxu0  ;;  %v216_v28 = vmul.f32 %v2174_v15, %v2771_v18 }
  0xcd   :  { %v156_v13 = vadd.f32 %v2165_v3, %v155_v12  ;;  %v2765_v14 = vsel %vm184_vm1, %v146_v7, %v192_v10  ;;  %v195_v19 = vmul.f32 0.01, %v161_v11  ;;  %vm187_vm4 = vcmp.ge.f32.partialorder %v161_v11, 0.0  ;;  %v2887_v7 = vld [vmem:[%s4245_s6 + $0x1b8] sm:$0xff]  ;;  %v2899_v10 = vld [vmem:[%s4245_s6 + $0x1b0] sm:$0xff] }
  0xce   :  { %v2239_v16 = vpop.f32.mrf.mxu0  ;;  %v215_v17 = vmul.f32 %v2174_v15, %v2765_v14  ;;  %v2910_v12 = vld [vmem:[%s4245_s6 + $0x198] sm:$0xff] }
  0xcf   :  { %v194_v20 = vmul.f32 0.01, %v156_v13  ;;  %v171_v21 = vadd.f32 %v2239_v16, %v2165_v3  ;;  %vm186_vm3 = vcmp.ge.f32.partialorder %v156_v13, 0.0  ;;  %v2777_v31 = vsel %vm187_vm4, %v161_v11, %v195_v19  ;;  %v2904_v11 = vld [vmem:[%s4245_s6 + $0x180] sm:$0xff]  ;;  %v2944_v19 = vld [vmem:[%s4245_s6 + $0x148] sm:$0xff] }
  0xd0   :  { %v165_v22 = vpop.f32.mrf.mxu0  ;;  %223 = vadd.xlane.f32.xlu0 %v215_v17  ;;  %v218_v37 = vmul.f32 %v2174_v15, %v2777_v31  ;;  %v2932_v17 = vld [vmem:[%s4245_s6 + $0x160] sm:$0xff] }
  0xd1   :  { %v197_v23 = vmul.f32 0.01, %v171_v21  ;;  %v166_v24 = vadd.f32 %v2165_v3, %v165_v22  ;;  %v2773_v25 = vsel %vm186_vm3, %v156_v13, %v194_v20  ;;  %vm189_vm5 = vcmp.ge.f32.partialorder %v171_v21, 0.0  ;;  %v2917_v13 = vld [vmem:[%s4245_s6 + $0x168] sm:$0xff]  ;;  %v2956_v22 = vld [vmem:[%s4245_s6 + $0x140] sm:$0xff] }
  0xd2   :  { %v2242_v26 = vpop.f32.mrf.mxu0  ;;  %v217_v27 = vmul.f32 %v2174_v15, %v2773_v25 }
  0xd3   :  { %v196_v29 = vmul.f32 0.01, %v166_v24  ;;  %v181_v30 = vadd.f32 %v2242_v26, %v2165_v3  ;;  %vm188_vm6 = vcmp.ge.f32.partialorder %v166_v24, 0.0  ;;  %v2781_v36 = vsel %vm189_vm5, %v171_v21, %v197_v23  ;;  %v2951_v21 = vld [vmem:[%s4245_s6 + $0x170] sm:$0xff]  ;;  %v2962_v23 = vld [vmem:[%s4245_s6 + $0x158] sm:$0xff] }
  0xd4   :  { %v175_v32 = vpop.f32.mrf.mxu0  ;;  %227 = vadd.xlane.f32.xlu1 %v217_v27  ;;  %225 = vadd.xlane.f32.xlu0 %v216_v28  ;;  %v220_v40 = vmul.f32 %v2174_v15, %v2781_v36  ;;  %v2976_v26 = vld [vmem:[%s4245_s6 + $0x150] sm:$0xff]  ;;  %v2984_v28 = vld [vmem:[%s4245_s6 + $0x120] sm:$0xff] }
  0xd5   :  { %v199_v33 = vmul.f32 0.01, %v181_v30  ;;  %v176_v34 = vadd.f32 %v2165_v3, %v175_v32  ;;  %v2779_v35 = vsel %vm188_vm6, %v166_v24, %v196_v29  ;;  %vm191_vm7 = vcmp.ge.f32.partialorder %v181_v30, 0.0  ;;  %v2969_v24 = vld [vmem:[%s4245_s6 + $0x128] sm:$0xff]  ;;  %v2991_v29 = vld [vmem:[%s4245_s6 + $0x138] sm:$0xff]  ;;  %v3003_v32 = vld [vmem:[%s4245_s6 + $0x130] sm:$0xff] }
  0xd6   :  { %v219_v38 = vmul.f32 %v2174_v15, %v2779_v35 }
  0xd7   :  { %v198_v39 = vmul.f32 0.01, %v176_v34  ;;  %vm190_vm8 = vcmp.ge.f32.partialorder %v176_v34, 0.0  ;;  %v2788_v42 = vsel %vm191_vm7, %v181_v30, %v199_v33  ;;  %v2996_v30 = vld [vmem:[%s4245_s6 + $0x108] sm:$0xff]  ;;  %v3008_v33 = vld [vmem:[%s4245_s6 + $0x100] sm:$0xff] }
  0xd8   :  { %229 = vadd.xlane.f32.xlu1 %v218_v37  ;;  %231 = vadd.xlane.f32.xlu0 %v219_v38  ;;  %v222_v49 = vmul.f32 %v2174_v15, %v2788_v42  ;;  %v3021_v37 = vld [vmem:[%s4245_s6 + $0xe8] sm:$0xff] }
  0xd9   :  { %v2786_v41 = vsel %vm190_vm8, %v176_v34, %v198_v39  ;;  %v3014_v34 = vld [vmem:[%s4245_s6 + $0x118] sm:$0xff]  ;;  %v3028_v39 = vld [vmem:[%s4245_s6 + $0x110] sm:$0xff] }
  0xda   :  { %v221_v44 = vmul.f32 %v2174_v15, %v2786_v41  ;;  %v2924_v15 = vld [vmem:[%s4245_s6 + $0x190] sm:$0xff] }
  0xdc   :  { %233 = vadd.xlane.f32.xlu1 %v220_v40  ;;  %235 = vadd.xlane.f32.xlu0 %v221_v44  ;;  %v3043_v44 = vld [vmem:[%s4245_s6 + $0xf8] sm:$0xff] }
  0xe0   :  { %237 = vadd.xlane.f32.xlu1 %v222_v49  ;;  %v3073_v49 = vld [vmem:[%s4245_s6 + $0xa8] sm:$0xff] }
 0x159   :  { %v224_v56 = vpop.xlane.xlu0 %223 }
 0x15a   :  { %v241_v57 = vadd.f32 %v2830_v55, %v224_v56 }
 0x15c   :  { %v249_v58 = vmul.f32 %v241_v57, %v2765_v14  ;;  %v3088_v57 = vld [vmem:[%s4245_s6 + $0xa0] sm:$0xff] }
 0x15d   :  { %v226_v61 = vpop.xlane.xlu0 %225  ;;  %v228_v3 = vpop.xlane.xlu1 %227 }
 0x15e   :  { %v242_v0 = vadd.f32 %v2830_v55, %v226_v61  ;;  %408 = vmatmul.mubr.f32.vlgmr.msra.gmra.mxu1 %v249_v58  ;;  %521 = vmatmul.mubr.f32.vlgmr.msra.gmra.mxu0 %v249_v58  ;;  %v243_v9 = vadd.f32 %v2830_v55, %v228_v3  ;;  %v3095_v58 = vld [vmem:[%s4245_s6 + $0xb8] sm:$0xff]  ;;  %v3112_v3 = vld [vmem:[%s4245_s6 + $0x80] sm:$0xff] }
 0x15f   :  { %670 = vmatpush1.msra.mxu1 %v2837_v59  ;;  %741 = vmatpush1.msra.mxu0 %v2842_v60  ;;  %4341 = vst [vmem:[#allocation10_spill] sm:$0xff] %v3112_v3 }
 0x160   :  { %v250_v4 = vmul.f32 %v242_v0, %v2771_v18  ;;  %671 = vmatprep.subr.mxu1 %v2847_v62  ;;  %742 = vmatprep.subr.mxu0 %v2852_v63  ;;  %v251_v16 = vmul.f32 %v243_v9, %v2773_v25  ;;  %v2939_v18 = vld [vmem:[%s4245_s6 + $0x178] sm:$0xff]  ;;  %v3107_v0 = vld [vmem:[%s4245_s6 + $0xb0] sm:$0xff]  ;;  %v3125_v9 = vld [vmem:[%s4245_s6 + $0x68] sm:$0xff] }
 0x161   :  { %672 = vmatpush1.msra.mxu1 %v2858_v1  ;;  %413 = vmatprep.mubr.f32.mxu1 %v4250_v53  ;;  %v230_v14 = vpop.xlane.xlu1 %229  ;;  %v232_v25 = vpop.xlane.xlu0 %231  ;;  %4343 = vst [vmem:[#allocation12_spill] sm:$0xff] %v3125_v9 }
 0x162   :  { %526 = vmatprep.mubr.f32.mxu0 %v4250_v53  ;;  %673 = vmatprep.subr.mxu1 %v2865_v2  ;;  %v244_v20 = vadd.f32 %v2830_v55, %v230_v14 }
 0x163   :  { %743 = vmatpush1.msra.mxu0 %v2873_v5  ;;  %414 = vmatmul.mubr.f32.gmra.mxu1 %v250_v4 }
 0x164   :  { %527 = vmatmul.mubr.f32.gmra.mxu0 %v250_v4  ;;  %674 = vmatpush1.msra.mxu1 %v2880_v6  ;;  %v252_v27 = vmul.f32 %v244_v20, %v2777_v31  ;;  %v245_v31 = vadd.f32 %v2830_v55, %v232_v25  ;;  %v3118_v4 = vld [vmem:[%s4245_s6 + $0x98] sm:$0xff]  ;;  %v3140_v25 = vld [vmem:[%s4245_s6 + $0x60] sm:$0xff] }
 0x165   :  { %744 = vmatprep.subr.mxu0 %v2887_v7  ;;  %675 = vmatprep.subr.mxu1 %v2892_v8  ;;  %v234_v38 = vpop.xlane.xlu1 %233  ;;  %v236_v50 = vpop.xlane.xlu0 %235  ;;  %4342 = vst [vmem:[#allocation11_spill] sm:$0xff] %v3118_v4  ;;  %4345 = vst [vmem:[#allocation14_spill] sm:$0xff] %v3140_v25 }
 0x166   :  { %745 = vmatpush1.msra.mxu0 %v2899_v10  ;;  %676 = vmatpush1.msra.mxu1 %v2904_v11  ;;  %v253_v40 = vmul.f32 %v245_v31, %v2779_v35  ;;  %v3048_v35 = vld [vmem:[%s4245_s6 + $0xc8] sm:$0xff]  ;;  %v246_v45 = vadd.f32 %v2830_v55, %v234_v38  ;;  %v247_v61 = vadd.f32 %v2830_v55, %v236_v50  ;;  %v3159_v38 = vld [vmem:[%s4245_s6 + $0x70] sm:$0xff] }
 0x167   :  { %746 = vmatprep.subr.mxu0 %v2910_v12  ;;  %419 = vmatprep.mubr.f32.mxu1 %v4250_v53  ;;  %4348 = vst [vmem:[#allocation17_spill] sm:$0xff] %v3159_v38  ;;  %v3184_v50 = vld [vmem:[%s4245_s6 + $0x50] sm:$0xff] }
 0x168   :  { %532 = vmatprep.mubr.f32.mxu0 %v4250_v53  ;;  %677 = vmatprep.subr.mxu1 %v2917_v13  ;;  %v254_v56 = vmul.f32 %v246_v45, %v2781_v36  ;;  %v3100_v36 = vld [vmem:[%s4245_s6 + $0x88] sm:$0xff]  ;;  %v255_v20 = vmul.f32 %v247_v61, %v2786_v41  ;;  %4352 = vst [vmem:[#allocation21_spill] sm:$0xff] %v3184_v50  ;;  %v3192_v61 = vld [vmem:[%s4245_s6 + $0x20] sm:$0xff] }
 0x169   :  { %747 = vmatpush1.msra.mxu0 %v2924_v15  ;;  %420 = vmatmul.mubr.f32.gmra.mxu1 %v251_v16  ;;  %4340 = vst [vmem:[#allocation9_spill] sm:$0xff] %v3100_v36  ;;  %v238_v14 = vpop.xlane.xlu1 %237  ;;  %v3152_v41 = vld [vmem:[%s4245_s6 + $0x48] sm:$0xff]  ;;  %4353 = vst [vmem:[#allocation22_spill] sm:$0xff] %v3192_v61 }
 0x16a   :  { %533 = vmatmul.mubr.f32.gmra.mxu0 %v251_v16  ;;  %678 = vmatpush1.msra.mxu1 %v2932_v17  ;;  %v3132_v16 = vld [vmem:[%s4245_s6 + $0x90] sm:$0xff]  ;;  %4347 = vst [vmem:[#allocation16_spill] sm:$0xff] %v3152_v41  ;;  %v248_v31 = vadd.f32 %v2830_v55, %v238_v14  ;;  %v3170_v55 = vld [vmem:[%s4245_s6 + $0x58] sm:$0xff]  ;;  %v3177_v45 = vld [vmem:[%s4245_s6 + $0x28] sm:$0xff] }
 0x16b   :  { %748 = vmatprep.subr.mxu0 %v2939_v18  ;;  %679 = vmatprep.subr.mxu1 %v2944_v19  ;;  %4344 = vst [vmem:[#allocation13_spill] sm:$0xff] %v3132_v16  ;;  %4350 = vst [vmem:[#allocation19_spill] sm:$0xff] %v3170_v55  ;;  %v3199_v14 = vld [vmem:[%s4245_s6 + $0x38] sm:$0xff] }
 0x16c   :  { %749 = vmatpush1.msra.mxu0 %v2951_v21  ;;  %680 = vmatpush1.msra.mxu1 %v2956_v22  ;;  %4351 = vst [vmem:[#allocation20_spill] sm:$0xff] %v3177_v45  ;;  %4354 = vst [vmem:[#allocation23_spill] sm:$0xff] %v3199_v14 }
 0x16d   :  { %750 = vmatprep.subr.mxu0 %v2962_v23  ;;  %425 = vmatprep.mubr.f32.mxu1 %v4250_v53 }
 0x16e   :  { %538 = vmatprep.mubr.f32.mxu0 %v4250_v53  ;;  %681 = vmatprep.subr.mxu1 %v2969_v24 }
 0x16f   :  { %751 = vmatpush1.msra.mxu0 %v2976_v26  ;;  %426 = vmatmul.mubr.f32.gmra.mxu1 %v252_v27 }
 0x170   :  { %539 = vmatmul.mubr.f32.gmra.mxu0 %v252_v27  ;;  %682 = vmatpush1.msra.mxu1 %v2984_v28  ;;  %v3147_v27 = vld [vmem:[%s4245_s6 + $0x78] sm:$0xff] }
 0x171   :  { %752 = vmatprep.subr.mxu0 %v2991_v29  ;;  %683 = vmatprep.subr.mxu1 %v2996_v30  ;;  %4346 = vst [vmem:[#allocation15_spill] sm:$0xff] %v3147_v27 }
 0x172   :  { %753 = vmatpush1.msra.mxu0 %v3003_v32  ;;  %684 = vmatpush1.msra.mxu1 %v3008_v33 }
 0x173   :  { %754 = vmatprep.subr.mxu0 %v3014_v34  ;;  %431 = vmatprep.mubr.f32.mxu1 %v4250_v53 }
 0x174   :  { %544 = vmatprep.mubr.f32.mxu0 %v4250_v53  ;;  %685 = vmatprep.subr.mxu1 %v3021_v37 }
 0x175   :  { %755 = vmatpush1.msra.mxu0 %v3028_v39  ;;  %432 = vmatmul.mubr.f32.gmra.mxu1 %v253_v40 }
 0x176   :  { %545 = vmatmul.mubr.f32.gmra.mxu0 %v253_v40  ;;  %686 = vmatpush1.msra.mxu1 %v3036_v43  ;;  %v3164_v40 = vld [vmem:[%s4245_s6 + $0x40] sm:$0xff] }
 0x177   :  { %756 = vmatprep.subr.mxu0 %v3043_v44  ;;  %687 = vmatprep.subr.mxu1 %v3048_v35  ;;  %4349 = vst [vmem:[#allocation18_spill] sm:$0xff] %v3164_v40 }
 0x178   :  { %757 = vmatpush1.msra.mxu0 %v3055_v46  ;;  %688 = vmatpush1.msra.mxu1 %v3060_v47 }
 0x179   :  { %758 = vmatprep.subr.mxu0 %v3066_v48  ;;  %437 = vmatprep.mubr.f32.mxu1 %v4250_v53 }
 0x17a   :  { %550 = vmatprep.mubr.f32.mxu0 %v4250_v53  ;;  %689 = vmatprep.subr.mxu1 %v3073_v49 }
 0x17b   :  { %759 = vmatpush1.msra.mxu0 %v3080_v51  ;;  %438 = vmatmul.mubr.f32.gmra.mxu1 %v254_v56 }
 0x17c   :  { %551 = vmatmul.mubr.f32.gmra.mxu0 %v254_v56  ;;  %690 = vmatpush1.msra.mxu1 %v3088_v57  ;;  %v256_v56 = vmul.f32 %v248_v31, %v2788_v42  ;;  %v3204_v42 = vld [vmem:[%s4245_s6 + $0x8] sm:$0xff]  ;;  %v3215_v31 = vld [vmem:[%s4245_s6] sm:$0xff] }
 0x17d   :  { %760 = vmatprep.subr.mxu0 %v3095_v58  ;;  %691 = vmatprep.subr.mxu1 %v3100_v36  ;;  %4355 = vst [vmem:[#allocation24_spill] sm:$0xff] %v3204_v42  ;;  %4357 = vst [vmem:[#allocation26_spill] sm:$0xff] %v3215_v31 }
 0x17e   :  { %761 = vmatpush1.msra.mxu0 %v3107_v0  ;;  %692 = vmatpush1.msra.mxu1 %v3112_v3 }
 0x17f   :  { %762 = vmatprep.subr.mxu0 %v3118_v4  ;;  %443 = vmatprep.mubr.f32.mxu1 %v4250_v53 }
 0x180   :  { %556 = vmatprep.mubr.f32.mxu0 %v4250_v53  ;;  %693 = vmatprep.subr.mxu1 %v3125_v9 }
 0x181   :  { %763 = vmatpush1.msra.mxu0 %v3132_v16  ;;  %444 = vmatmul.mubr.f32.gmra.mxu1 %v255_v20 }
 0x182   :  { %557 = vmatmul.mubr.f32.gmra.mxu0 %v255_v20  ;;  %694 = vmatpush1.msra.mxu1 %v3140_v25  ;;  %v3210_v20 = vld [vmem:[%s4245_s6 + $0x30] sm:$0xff] }
 0x183   :  { %764 = vmatprep.subr.mxu0 %v3147_v27  ;;  %695 = vmatprep.subr.mxu1 %v3152_v41  ;;  %4356 = vst [vmem:[#allocation25_spill] sm:$0xff] %v3210_v20 }
 0x184   :  { %765 = vmatpush1.msra.mxu0 %v3159_v38  ;;  %696 = vmatpush1.msra.mxu1 %v3164_v40 }
 0x185   :  { %766 = vmatprep.subr.mxu0 %v3170_v55  ;;  %449 = vmatprep.mubr.f32.mxu1 %v4250_v53 }
 0x186   :  { %562 = vmatprep.mubr.f32.mxu0 %v4250_v53  ;;  %697 = vmatprep.subr.mxu1 %v3177_v45  ;;  %v3221_v53 = vld [vmem:[%s4245_s6 + $0x18] sm:$0xff]  ;;  %v3228_v45 = vld [vmem:[%s4245_s6 + $0x10] sm:$0xff] }
 0x187   :  { %767 = vmatpush1.msra.mxu0 %v3184_v50  ;;  %450 = vmatmul.mubr.f32.gmra.mxu1 %v256_v56  ;;  %4358 = vst [vmem:[#allocation27_spill] sm:$0xff] %v3221_v53  ;;  %4359 = vst [vmem:[#allocation28_spill] sm:$0xff] %v3228_v45 }
 0x188   :  { %563 = vmatmul.mubr.f32.gmra.mxu0 %v256_v56  ;;  %698 = vmatpush1.msra.mxu1 %v3192_v61  ;;  %v4360_v56 = vmov 0.0  }
 0x189   :  { %768 = vmatprep.subr.mxu0 %v3199_v14  ;;  %699 = vmatprep.subr.mxu1 %v3204_v42 }
 0x18a   :  { %769 = vmatpush1.msra.mxu0 %v3210_v20  ;;  %700 = vmatpush1.msra.mxu1 %v3215_v31 }
 0x18b   :  { %770 = vmatprep.subr.mxu0 %v3221_v53  ;;  %733 = vmatprep.mubr.f32.mxu1 %v4360_v56 }
 0x18c   :  { %771 = vmatpush1.msra.mxu0 %v3228_v45  ;;  %804 = vmatprep.mubr.f32.mxu0 %v4360_v56 }
 0x18d   :  { %734 = vmatmul.mubr.f32.vlgmr.msra.gmra.mxu1 %v4360_v56  ;;  %805 = vmatmul.mubr.f32.vlgmr.msra.gmra.mxu0 %v4360_v56 }
 0x18e   :  { %843 = vmatprep.subr.mxu1 %v2816_v52  ;;  %914 = vmatprep.subr.mxu0 %v2822_v54 }
 0x18f   :  { %844 = vmatpush1.msra.mxu1 %v2837_v59  ;;  %915 = vmatpush1.msra.mxu0 %v2842_v60 }
 0x190   :  { %845 = vmatprep.subr.mxu1 %v2847_v62  ;;  %916 = vmatprep.subr.mxu0 %v2852_v63 }
 0x191   :  { %846 = vmatpush1.msra.mxu1 %v2858_v1  ;;  %917 = vmatpush1.msra.mxu0 %v2873_v5 }
 0x192   :  { %847 = vmatprep.subr.mxu1 %v2865_v2  ;;  %918 = vmatprep.subr.mxu0 %v2887_v7 }
 0x193   :  { %848 = vmatpush1.msra.mxu1 %v2880_v6  ;;  %919 = vmatpush1.msra.mxu0 %v2899_v10 }
 0x194   :  { %849 = vmatprep.subr.mxu1 %v2892_v8  ;;  %920 = vmatprep.subr.mxu0 %v2910_v12 }
 0x195   :  { %850 = vmatpush1.msra.mxu1 %v2904_v11  ;;  %921 = vmatpush1.msra.mxu0 %v2924_v15 }
 0x196   :  { %851 = vmatprep.subr.mxu1 %v2917_v13  ;;  %922 = vmatprep.subr.mxu0 %v2939_v18 }
 0x197   :  { %852 = vmatpush1.msra.mxu1 %v2932_v17  ;;  %923 = vmatpush1.msra.mxu0 %v2951_v21 }
 0x198   :  { %853 = vmatprep.subr.mxu1 %v2944_v19  ;;  %924 = vmatprep.subr.mxu0 %v2962_v23 }
 0x199   :  { %854 = vmatpush1.msra.mxu1 %v2956_v22  ;;  %925 = vmatpush1.msra.mxu0 %v2976_v26 }
 0x19a   :  { %855 = vmatprep.subr.mxu1 %v2969_v24  ;;  %926 = vmatprep.subr.mxu0 %v2991_v29 }
 0x19b   :  { %856 = vmatpush1.msra.mxu1 %v2984_v28  ;;  %927 = vmatpush1.msra.mxu0 %v3003_v32 }
 0x19c   :  { %857 = vmatprep.subr.mxu1 %v2996_v30  ;;  %928 = vmatprep.subr.mxu0 %v3014_v34 }
 0x19d   :  { %858 = vmatpush1.msra.mxu1 %v3008_v33  ;;  %929 = vmatpush1.msra.mxu0 %v3028_v39 }
 0x19e   :  { %859 = vmatprep.subr.mxu1 %v3021_v37  ;;  %930 = vmatprep.subr.mxu0 %v3043_v44 }
 0x19f   :  { %860 = vmatpush1.msra.mxu1 %v3036_v43  ;;  %931 = vmatpush1.msra.mxu0 %v3055_v46 }
 0x1a0   :  { %861 = vmatprep.subr.mxu1 %v3048_v35  ;;  %932 = vmatprep.subr.mxu0 %v3066_v48 }
 0x1a1   :  { %862 = vmatpush1.msra.mxu1 %v3060_v47  ;;  %933 = vmatpush1.msra.mxu0 %v3080_v51 }
 0x1a2   :  { %863 = vmatprep.subr.mxu1 %v3073_v49  ;;  %934 = vmatprep.subr.mxu0 %v3095_v58 }
 0x1a3   :  { %864 = vmatpush1.msra.mxu1 %v3088_v57  ;;  %935 = vmatpush1.msra.mxu0 %v3107_v0 }
 0x1a4   :  { %865 = vmatprep.subr.mxu1 %v3100_v36  ;;  %936 = vmatprep.subr.mxu0 %v3118_v4  ;;  %v4361_v4 = vld [vmem:[#allocation20_spill] sm:$0xff] }
 0x1a5   :  { %866 = vmatpush1.msra.mxu1 %v3112_v3  ;;  %937 = vmatpush1.msra.mxu0 %v3132_v16 }
 0x1a6   :  { %867 = vmatprep.subr.mxu1 %v3125_v9  ;;  %938 = vmatprep.subr.mxu0 %v3147_v27 }
 0x1a7   :  { %868 = vmatpush1.msra.mxu1 %v3140_v25  ;;  %939 = vmatpush1.msra.mxu0 %v3159_v38 }
 0x1a8   :  { %869 = vmatprep.subr.mxu1 %v3152_v41  ;;  %940 = vmatprep.subr.mxu0 %v3170_v55 }
 0x1a9   :  { %870 = vmatpush1.msra.mxu1 %v3164_v40  ;;  %941 = vmatpush1.msra.mxu0 %v3184_v50 }
 0x1aa   :  { %871 = vmatprep.subr.mxu1 %v4361_v4  ;;  %942 = vmatprep.subr.mxu0 %v3199_v14  ;;  %v323_v14 = vlaneseq }
 0x1ab   :  { %872 = vmatpush1.msra.mxu1 %v3192_v61  ;;  %943 = vmatpush1.msra.mxu0 %v3210_v20 }
 0x1ac   :  { %873 = vmatprep.subr.mxu1 %v3204_v42  ;;  %944 = vmatprep.subr.mxu0 %v3221_v53  ;;  %v324_v61 = vshrl.u32 %v323_v14, 7 }
 0x1ad   :  { %874 = vmatpush1.msra.mxu1 %v3215_v31  ;;  %907 = vmatprep.mubr.f32.mxu1 %v4360_v56  ;;  %v321_v31 = vld [vmem:[%s4246_s7] sm:$0xf] }
 0x1ae   :  { %945 = vmatpush1.msra.mxu0 %v3228_v45  ;;  %978 = vmatprep.mubr.f32.mxu0 %v4360_v56  ;;  %v325_v4 = vsub.s32 0, %v324_v61  ;;  %v333_v53 = vsub.s32 2, %v324_v61  ;;  %v329_v50 = vsub.s32 1, %v324_v61 }
 0x1af   :  { %1017 = vmatprep.subr.mxu1 %v2816_v52  ;;  %1088 = vmatprep.subr.mxu0 %v2822_v54  ;;  %v337_v52 = vsub.s32 3, %v324_v61 }
 0x1b0   :  { %v326_v40 = vrot.slane %v321_v31, %v325_v4  ;;  %v3317_v54 = vrot.slane %v321_v31, %v333_v53  ;;  %v330_v55 = vrot.slane %v321_v31, %v329_v50 }
 0x1b1   :  { %v3321_v25 = vrot.slane %v321_v31, %v337_v52 }
 0x21e   :  { %v3306_v20 = vpop.f32.mrf.mxu1  ;;  %v3308_v42 = vpop.f32.mrf.mxu0 }
 0x220   :  { %v3313_v45 = vpop.f32.mrf.mxu1  ;;  %v3315_v56 = vpop.f32.mrf.mxu0 }
 0x223   :  { %v415_v14 = vpop.f32.mrf.mxu1 }
 0x224   :  { %v3319_v41 = vadd.f32 %v415_v14, %v326_v40  ;;  %v528_v38 = vpop.f32.mrf.mxu0 }
 0x225   :  { %v3324_v27 = vadd.f32 %v528_v38, %v3317_v54  ;;  %v417_v9 = vpop.f32.mrf.mxu1 }
 0x226   :  { %4362 = vst [vmem:[#allocation29_spill] sm:$0xff] %v3319_v41  ;;  %v3326_v16 = vadd.f32 %v417_v9, %v330_v55  ;;  %v530_v3 = vpop.f32.mrf.mxu0 }
 0x227   :  { %4363 = vst [vmem:[#allocation30_spill] sm:$0xff] %v3324_v27  ;;  %v3329_v36 = vadd.f32 %v530_v3, %v3321_v25 }
 0x228   :  { %4364 = vst [vmem:[#allocation31_spill] sm:$0xff] %v3326_v16 }
 0x229   :  { %4365 = vst [vmem:[#allocation32_spill] sm:$0xff] %v3329_v36  ;;  %v421_v4 = vpop.f32.mrf.mxu1 }
 0x22a   :  { %v3331_v53 = vadd.f32 %v421_v4, %v326_v40  ;;  %v534_v61 = vpop.f32.mrf.mxu0 }
 0x22b   :  { %v3334_v50 = vadd.f32 %v534_v61, %v3317_v54  ;;  %v423_v14 = vpop.f32.mrf.mxu1 }
 0x22c   :  { %4366 = vst [vmem:[#allocation33_spill] sm:$0xff] %v3331_v53  ;;  %v3336_v52 = vadd.f32 %v423_v14, %v330_v55  ;;  %v536_v31 = vpop.f32.mrf.mxu0 }
 0x22d   :  { %4367 = vst [vmem:[#allocation34_spill] sm:$0xff] %v3334_v50  ;;  %v3339_v38 = vadd.f32 %v536_v31, %v3321_v25 }
 0x22e   :  { %4368 = vst [vmem:[#allocation35_spill] sm:$0xff] %v3336_v52 }
 0x22f   :  { %4369 = vst [vmem:[#allocation36_spill] sm:$0xff] %v3339_v38  ;;  %v427_v9 = vpop.f32.mrf.mxu1 }
 0x230   :  { %v3341_v27 = vadd.f32 %v427_v9, %v326_v40  ;;  %v540_v16 = vpop.f32.mrf.mxu0 }
 0x231   :  { %v3344_v3 = vadd.f32 %v540_v16, %v3317_v54  ;;  %v429_v4 = vpop.f32.mrf.mxu1 }
 0x232   :  { %4370 = vst [vmem:[#allocation37_spill] sm:$0xff] %v3341_v27  ;;  %v3346_v53 = vadd.f32 %v429_v4, %v330_v55  ;;  %v542_v36 = vpop.f32.mrf.mxu0 }
 0x233   :  { %4371 = vst [vmem:[#allocation38_spill] sm:$0xff] %v3344_v3  ;;  %v3349_v61 = vadd.f32 %v542_v36, %v3321_v25 }
 0x234   :  { %4372 = vst [vmem:[#allocation39_spill] sm:$0xff] %v3346_v53 }
 0x235   :  { %4373 = vst [vmem:[#allocation40_spill] sm:$0xff] %v3349_v61  ;;  %v433_v14 = vpop.f32.mrf.mxu1 }
 0x236   :  { %v3351_v50 = vadd.f32 %v433_v14, %v326_v40  ;;  %v546_v52 = vpop.f32.mrf.mxu0 }
 0x237   :  { %v3354_v31 = vadd.f32 %v546_v52, %v3317_v54  ;;  %v435_v9 = vpop.f32.mrf.mxu1 }
 0x238   :  { %4374 = vst [vmem:[#allocation41_spill] sm:$0xff] %v3351_v50  ;;  %v3356_v27 = vadd.f32 %v435_v9, %v330_v55  ;;  %v548_v38 = vpop.f32.mrf.mxu0 }
 0x239   :  { %4375 = vst [vmem:[#allocation42_spill] sm:$0xff] %v3354_v31  ;;  %v3359_v16 = vadd.f32 %v548_v38, %v3321_v25 }
 0x23a   :  { %4376 = vst [vmem:[#allocation43_spill] sm:$0xff] %v3356_v27 }
 0x23b   :  { %4377 = vst [vmem:[#allocation44_spill] sm:$0xff] %v3359_v16  ;;  %v439_v4 = vpop.f32.mrf.mxu1 }
 0x23c   :  { %v3361_v3 = vadd.f32 %v439_v4, %v326_v40  ;;  %v552_v53 = vpop.f32.mrf.mxu0 }
 0x23d   :  { %v3364_v36 = vadd.f32 %v552_v53, %v3317_v54  ;;  %v441_v14 = vpop.f32.mrf.mxu1 }
 0x23e   :  { %4378 = vst [vmem:[#allocation45_spill] sm:$0xff] %v3361_v3  ;;  %v3366_v50 = vadd.f32 %v441_v14, %v330_v55  ;;  %v554_v61 = vpop.f32.mrf.mxu0 }
 0x23f   :  { %4379 = vst [vmem:[#allocation46_spill] sm:$0xff] %v3364_v36  ;;  %v3369_v52 = vadd.f32 %v554_v61, %v3321_v25 }
 0x240   :  { %4380 = vst [vmem:[#allocation47_spill] sm:$0xff] %v3366_v50 }
 0x241   :  { %4381 = vst [vmem:[#allocation48_spill] sm:$0xff] %v3369_v52  ;;  %v445_v9 = vpop.f32.mrf.mxu1 }
 0x242   :  { %v3371_v31 = vadd.f32 %v445_v9, %v326_v40  ;;  %v558_v27 = vpop.f32.mrf.mxu0 }
 0x243   :  { %v3374_v38 = vadd.f32 %v558_v27, %v3317_v54  ;;  %v447_v4 = vpop.f32.mrf.mxu1 }
 0x244   :  { %4382 = vst [vmem:[#allocation49_spill] sm:$0xff] %v3371_v31  ;;  %v3376_v3 = vadd.f32 %v447_v4, %v330_v55  ;;  %v560_v16 = vpop.f32.mrf.mxu0  ;;  %v410_v4 = vadd.f32 %v3306_v20, %v326_v40 }
 0x245   :  { %4383 = vst [vmem:[#allocation50_spill] sm:$0xff] %v3374_v38  ;;  %v3379_v53 = vadd.f32 %v560_v16, %v3321_v25  ;;  %v412_v16 = vadd.f32 %v3313_v45, %v330_v55 }
 0x246   :  { %4384 = vst [vmem:[#allocation51_spill] sm:$0xff] %v3376_v3 }
 0x247   :  { %4385 = vst [vmem:[#allocation52_spill] sm:$0xff] %v3379_v53  ;;  %v451_v14 = vpop.f32.mrf.mxu1 }
 0x248   :  { %v3381_v36 = vadd.f32 %v451_v14, %v326_v40  ;;  %v564_v50 = vpop.f32.mrf.mxu0 }
 0x249   :  { %v3384_v61 = vadd.f32 %v564_v50, %v3317_v54  ;;  %v453_v9 = vpop.f32.mrf.mxu1 }
 0x24a   :  { %4386 = vst [vmem:[#allocation53_spill] sm:$0xff] %v3381_v36  ;;  %v3386_v31 = vadd.f32 %v453_v9, %v330_v55  ;;  %v566_v52 = vpop.f32.mrf.mxu0  ;;  %v525_v9 = vadd.f32 %v3315_v56, %v3321_v25 }
 0x24b   :  { %4387 = vst [vmem:[#allocation54_spill] sm:$0xff] %v3384_v61  ;;  %v3389_v27 = vadd.f32 %v566_v52, %v3321_v25  ;;  %v523_v52 = vadd.f32 %v3308_v42, %v3317_v54 }
 0x24c   :  { %4388 = vst [vmem:[#allocation55_spill] sm:$0xff] %v3386_v31 }
 0x24d   :  { %4389 = vst [vmem:[#allocation56_spill] sm:$0xff] %v3389_v27  ;;  %v735_v38 = vpop.f32.mrf.mxu1  ;;  %v806_v41 = vpop.f32.mrf.mxu0 }
 0x24e   :  { %v811_v53 = vadd.f32 %v735_v38, %v410_v4  ;;  %v813_v27 = vadd.f32 %v806_v41, %v523_v52  ;;  %v4395_v52 = vld [vmem:[#allocation15_spill] sm:$0xff] }
 0x24f   :  { %v737_v3 = vpop.f32.mrf.mxu1  ;;  %v808_v61 = vpop.f32.mrf.mxu0 }
 0x250   :  { %v2175_v14 = vmul.f32 -1.442695, %v811_v53  ;;  %v812_v36 = vadd.f32 %v737_v3, %v412_v16  ;;  %v814_v31 = vadd.f32 %v808_v61, %v525_v9  ;;  %v4394_v9 = vld [vmem:[#allocation12_spill] sm:$0xff] }
 0x252   :  { %2281 = vpow2.f32 %v2175_v14  ;;  %v2176_v50 = vmul.f32 -1.442695, %v812_v36  ;;  %v2177_v40 = vmul.f32 -1.442695, %v814_v31  ;;  %v4390_v31 = vld [vmem:[#allocation9_spill] sm:$0xff]  ;;  %v4392_v14 = vld [vmem:[#allocation10_spill] sm:$0xff] }
 0x254   :  { %2283 = vpow2.f32 %v2176_v50  ;;  %v4393_v50 = vld [vmem:[#allocation13_spill] sm:$0xff] }
 0x255   :  { %2285 = vpow2.f32 %v2177_v40  ;;  %v4396_v40 = vld [vmem:[#allocation14_spill] sm:$0xff] }
 0x25f   :  { %v2282_v20 = vpop.eup %2281 }
 0x260   :  { %v818_v55 = vadd.f32 1.0, %v2282_v20  ;;  %v4397_v20 = vld [vmem:[#allocation17_spill] sm:$0xff] }
 0x261   :  { %v2284_v45 = vpop.eup %2283 }
 0x262   :  { %2287 = vrcp.f32 %v818_v55  ;;  %v824_v3 = vadd.f32 1.0, %v2284_v45  ;;  %v2286_v36 = vpop.eup %2285  ;;  %v4398_v55 = vld [vmem:[#allocation16_spill] sm:$0xff]  ;;  %v4399_v45 = vld [vmem:[#allocation19_spill] sm:$0xff] }
 0x263   :  { %2289 = vtanh.f32 %v813_v27  ;;  %v831_v16 = vadd.f32 1.0, %v2286_v36  ;;  %v4391_v27 = vld [vmem:[#allocation11_spill] sm:$0xff]  ;;  %v4401_v36 = vld [vmem:[#allocation21_spill] sm:$0xff] }
 0x264   :  { %2291 = vrcp.f32 %v824_v3  ;;  %v4400_v3 = vld [vmem:[#allocation18_spill] sm:$0xff] }
 0x265   :  { %2293 = vrcp.f32 %v831_v16  ;;  %v4405_v16 = vld [vmem:[#allocation25_spill] sm:$0xff] }
 0x26f   :  { %v2288_v38 = vpop.eup %2287 }
 0x270   :  { %v2290_v53 = vpop.eup %2289 }
 0x271   :  { %v2292_v4 = vpop.eup %2291  ;;  %v835_v56 = vmul.f32 %v2290_v53, %v2288_v38  ;;  %v4402_v38 = vld [vmem:[#allocation20_spill] sm:$0xff]  ;;  %v4403_v53 = vld [vmem:[#allocation23_spill] sm:$0xff] }
 0x272   :  { %v834_v25 = vmul.f32 0.0, %v2292_v4  ;;  %v2294_v54 = vpop.eup %2293  ;;  %v4404_v4 = vld [vmem:[#allocation22_spill] sm:$0xff] }
 0x274   :  { %v3397_v61 = vadd.f32 %v835_v56, %v834_v25  ;;  %v4406_v25 = vld [vmem:[#allocation24_spill] sm:$0xff]  ;;  %v4407_v56 = vld [vmem:[#allocation27_spill] sm:$0xff] }
 0x276   :  { %2295 = vtanh.f32 %v3397_v61 }
 0x283   :  { %v2296_v41 = vpop.eup %2295 }
 0x284   :  { %v838_v42 = vmul.f32 %v2296_v41, %v2294_v54  ;;  %v4408_v54 = vld [vmem:[#allocation26_spill] sm:$0xff]  ;;  %v4409_v41 = vmov 0.0  }
 0x286   :  { %908 = vmatmul.mubr.f32.vlgmr.msra.gmra.mxu1 %v838_v42  ;;  %979 = vmatmul.mubr.f32.vlgmr.msra.gmra.mxu0 %v838_v42  ;;  %v4410_v42 = vld [vmem:[#allocation28_spill] sm:$0xff] }
 0x287   :  { %1018 = vmatpush1.msra.mxu1 %v2837_v59  ;;  %1089 = vmatpush1.msra.mxu0 %v2842_v60 }
 0x288   :  { %1019 = vmatprep.subr.mxu1 %v2847_v62  ;;  %1090 = vmatprep.subr.mxu0 %v2852_v63 }
 0x289   :  { %1020 = vmatpush1.msra.mxu1 %v2858_v1  ;;  %1091 = vmatpush1.msra.mxu0 %v2873_v5 }
 0x28a   :  { %1021 = vmatprep.subr.mxu1 %v2865_v2  ;;  %1092 = vmatprep.subr.mxu0 %v2887_v7 }
 0x28b   :  { %1022 = vmatpush1.msra.mxu1 %v2880_v6  ;;  %1093 = vmatpush1.msra.mxu0 %v2899_v10 }
 0x28c   :  { %1023 = vmatprep.subr.mxu1 %v2892_v8  ;;  %1094 = vmatprep.subr.mxu0 %v2910_v12 }
 0x28d   :  { %1024 = vmatpush1.msra.mxu1 %v2904_v11  ;;  %1095 = vmatpush1.msra.mxu0 %v2924_v15 }
 0x28e   :  { %1025 = vmatprep.subr.mxu1 %v2917_v13  ;;  %1096 = vmatprep.subr.mxu0 %v2939_v18 }
 0x28f   :  { %1026 = vmatpush1.msra.mxu1 %v2932_v17  ;;  %1097 = vmatpush1.msra.mxu0 %v2951_v21 }
 0x290   :  { %1027 = vmatprep.subr.mxu1 %v2944_v19  ;;  %1098 = vmatprep.subr.mxu0 %v2962_v23 }
 0x291   :  { %1028 = vmatpush1.msra.mxu1 %v2956_v22  ;;  %1099 = vmatpush1.msra.mxu0 %v2976_v26 }
 0x292   :  { %1029 = vmatprep.subr.mxu1 %v2969_v24  ;;  %1100 = vmatprep.subr.mxu0 %v2991_v29 }
 0x293   :  { %1030 = vmatpush1.msra.mxu1 %v2984_v28  ;;  %1101 = vmatpush1.msra.mxu0 %v3003_v32 }
 0x294   :  { %1031 = vmatprep.subr.mxu1 %v2996_v30  ;;  %1102 = vmatprep.subr.mxu0 %v3014_v34 }
 0x295   :  { %1032 = vmatpush1.msra.mxu1 %v3008_v33  ;;  %1103 = vmatpush1.msra.mxu0 %v3028_v39 }
 0x296   :  { %1033 = vmatprep.subr.mxu1 %v3021_v37  ;;  %1104 = vmatprep.subr.mxu0 %v3043_v44 }
 0x297   :  { %1034 = vmatpush1.msra.mxu1 %v3036_v43  ;;  %1105 = vmatpush1.msra.mxu0 %v3055_v46 }
 0x298   :  { %1035 = vmatprep.subr.mxu1 %v3048_v35  ;;  %1106 = vmatprep.subr.mxu0 %v3066_v48 }
 0x299   :  { %1036 = vmatpush1.msra.mxu1 %v3060_v47  ;;  %1107 = vmatpush1.msra.mxu0 %v3080_v51 }
 0x29a   :  { %1037 = vmatprep.subr.mxu1 %v3073_v49  ;;  %1108 = vmatprep.subr.mxu0 %v3095_v58 }
 0x29b   :  { %1038 = vmatpush1.msra.mxu1 %v3088_v57  ;;  %1109 = vmatpush1.msra.mxu0 %v3107_v0 }
 0x29c   :  { %1039 = vmatprep.subr.mxu1 %v4390_v31  ;;  %1110 = vmatprep.subr.mxu0 %v4391_v27 }
 0x29d   :  { %1040 = vmatpush1.msra.mxu1 %v4392_v14  ;;  %1111 = vmatpush1.msra.mxu0 %v4393_v50 }
 0x29e   :  { %1041 = vmatprep.subr.mxu1 %v4394_v9  ;;  %1112 = vmatprep.subr.mxu0 %v4395_v52  ;;  %v4416_v52 = vld [vmem:[#allocation30_spill] sm:$0xff] }
 0x29f   :  { %1042 = vmatpush1.msra.mxu1 %v4396_v40  ;;  %1113 = vmatpush1.msra.mxu0 %v4397_v20  ;;  %v4415_v40 = vld [vmem:[#allocation32_spill] sm:$0xff] }
 0x2a0   :  { %1043 = vmatprep.subr.mxu1 %v4398_v55  ;;  %1114 = vmatprep.subr.mxu0 %v4399_v45 }
 0x2a1   :  { %1044 = vmatpush1.msra.mxu1 %v4400_v3  ;;  %1115 = vmatpush1.msra.mxu0 %v4401_v36  ;;  %v4411_v36 = vld [vmem:[#allocation7_spill] sm:$0xff] }
 0x2a2   :  { %1045 = vmatprep.subr.mxu1 %v4402_v38  ;;  %1116 = vmatprep.subr.mxu0 %v4403_v53  ;;  %v4412_v38 = vld [vmem:[#allocation8_spill] sm:$0xff] }
 0x2a3   :  { %1046 = vmatpush1.msra.mxu1 %v4404_v4  ;;  %1117 = vmatpush1.msra.mxu0 %v4405_v16  ;;  %v4413_v4 = vld [vmem:[#allocation29_spill] sm:$0xff] }
 0x2a4   :  { %1047 = vmatprep.subr.mxu1 %v4406_v25  ;;  %1118 = vmatprep.subr.mxu0 %v4407_v56  ;;  %v4414_v25 = vld [vmem:[#allocation31_spill] sm:$0xff] }
 0x2a5   :  { %1048 = vmatpush1.msra.mxu1 %v4408_v54  ;;  %1081 = vmatprep.mubr.f32.mxu1 %v4409_v41 }
 0x2a6   :  { %1119 = vmatpush1.msra.mxu0 %v4410_v42  ;;  %1152 = vmatprep.mubr.f32.mxu0 %v4409_v41 }
 0x2a7   :  { %1191 = vmatprep.subr.mxu1 %v4411_v36  ;;  %1262 = vmatprep.subr.mxu0 %v4412_v38 }
 0x346   :  { %v909_v53 = vpop.f32.mrf.mxu1  ;;  %v980_v56 = vpop.f32.mrf.mxu0 }
 0x347   :  { %v985_v3 = vadd.f32 %v909_v53, %v4413_v4  ;;  %v987_v41 = vadd.f32 %v980_v56, %v4416_v52 }
 0x348   :  { %v911_v16 = vpop.f32.mrf.mxu1  ;;  %v982_v20 = vpop.f32.mrf.mxu0 }
 0x349   :  { %v2178_v45 = vmul.f32 -1.442695, %v985_v3  ;;  %v986_v55 = vadd.f32 %v911_v16, %v4414_v25  ;;  %v988_v42 = vadd.f32 %v982_v20, %v4415_v40 }
 0x34b   :  { %2297 = vpow2.f32 %v2178_v45  ;;  %v2179_v54 = vmul.f32 -1.442695, %v986_v55  ;;  %v2180_v9 = vmul.f32 -1.442695, %v988_v42 }
 0x34d   :  { %2299 = vpow2.f32 %v2179_v54 }
 0x34e   :  { %2301 = vtanh.f32 %v987_v41 }
 0x34f   :  { %2303 = vpow2.f32 %v2180_v9  ;;  %v4440_v9 = vld [vmem:[#allocation34_spill] sm:$0xff] }
 0x358   :  { %v2298_v36 = vpop.eup %2297 }
 0x359   :  { %v992_v50 = vadd.f32 1.0, %v2298_v36 }
 0x35a   :  { %v2300_v38 = vpop.eup %2299 }
 0x35b   :  { %2305 = vrcp.f32 %v992_v50  ;;  %v998_v53 = vadd.f32 1.0, %v2300_v38  ;;  %v2302_v3 = vpop.eup %2301 }
 0x35c   :  { %v2304_v4 = vpop.eup %2303 }
 0x35d   :  { %2307 = vrcp.f32 %v998_v53  ;;  %v1005_v25 = vadd.f32 1.0, %v2304_v4 }
 0x35f   :  { %2309 = vrcp.f32 %v1005_v25 }
 0x368   :  { %v2306_v45 = vpop.eup %2305 }
 0x369   :  { %v1009_v16 = vmul.f32 %v2306_v45, %v2302_v3 }
 0x36a   :  { %v2308_v55 = vpop.eup %2307 }
 0x36b   :  { %v1008_v54 = vmul.f32 %v2308_v55, %v3397_v61  ;;  %v4439_v61 = vld [vmem:[#allocation36_spill] sm:$0xff] }
 0x36c   :  { %v2310_v52 = vpop.eup %2309 }
 0x36d   :  { %v3471_v40 = vadd.f32 %v1009_v16, %v1008_v54 }
 0x36f   :  { %2311 = vtanh.f32 %v3471_v40 }
 0x37c   :  { %v2312_v20 = vpop.eup %2311 }
 0x37d   :  { %v1012_v56 = vmul.f32 %v2312_v20, %v2310_v52 }
 0x37f   :  { %1082 = vmatmul.mubr.f32.vlgmr.msra.gmra.mxu1 %v1012_v56  ;;  %1153 = vmatmul.mubr.f32.vlgmr.msra.gmra.mxu0 %v1012_v56 }
 0x380   :  { %1192 = vmatpush1.msra.mxu1 %v2837_v59  ;;  %1263 = vmatpush1.msra.mxu0 %v2842_v60  ;;  %v4417_v59 = vld [vmem:[#allocation13_spill] sm:$0xff]  ;;  %v4418_v60 = vld [vmem:[#allocation12_spill] sm:$0xff] }
 0x381   :  { %1193 = vmatprep.subr.mxu1 %v2847_v62  ;;  %1264 = vmatprep.subr.mxu0 %v2852_v63  ;;  %v4419_v62 = vld [vmem:[#allocation15_spill] sm:$0xff]  ;;  %v4420_v63 = vld [vmem:[#allocation14_spill] sm:$0xff] }
 0x382   :  { %1194 = vmatpush1.msra.mxu1 %v2858_v1  ;;  %1265 = vmatpush1.msra.mxu0 %v2873_v5  ;;  %v4421_v1 = vld [vmem:[#allocation17_spill] sm:$0xff]  ;;  %v4423_v5 = vld [vmem:[#allocation19_spill] sm:$0xff] }
 0x383   :  { %1195 = vmatprep.subr.mxu1 %v2865_v2  ;;  %1266 = vmatprep.subr.mxu0 %v2887_v7  ;;  %v4422_v2 = vld [vmem:[#allocation16_spill] sm:$0xff]  ;;  %v4425_v7 = vld [vmem:[#allocation21_spill] sm:$0xff] }
 0x384   :  { %1196 = vmatpush1.msra.mxu1 %v2880_v6  ;;  %1267 = vmatpush1.msra.mxu0 %v2899_v10  ;;  %v4424_v6 = vld [vmem:[#allocation18_spill] sm:$0xff]  ;;  %v4427_v10 = vld [vmem:[#allocation23_spill] sm:$0xff] }
 0x385   :  { %1197 = vmatprep.subr.mxu1 %v2892_v8  ;;  %1268 = vmatprep.subr.mxu0 %v2910_v12  ;;  %v4426_v8 = vld [vmem:[#allocation20_spill] sm:$0xff]  ;;  %v4429_v12 = vld [vmem:[#allocation25_spill] sm:$0xff] }
 0x386   :  { %1198 = vmatpush1.msra.mxu1 %v2904_v11  ;;  %1269 = vmatpush1.msra.mxu0 %v2924_v15  ;;  %v4428_v11 = vld [vmem:[#allocation22_spill] sm:$0xff]  ;;  %v4431_v15 = vld [vmem:[#allocation27_spill] sm:$0xff] }
 0x387   :  { %1199 = vmatprep.subr.mxu1 %v2917_v13  ;;  %1270 = vmatprep.subr.mxu0 %v2939_v18  ;;  %v4430_v13 = vld [vmem:[#allocation24_spill] sm:$0xff]  ;;  %v4433_v18 = vmov 0.0  }
 0x388   :  { %1200 = vmatpush1.msra.mxu1 %v2932_v17  ;;  %1271 = vmatpush1.msra.mxu0 %v2951_v21  ;;  %v4432_v17 = vld [vmem:[#allocation26_spill] sm:$0xff]  ;;  %v3541_v21 = vld [vmem:[%s4245_s6 + $0x1e8] sm:$0xff] }
 0x389   :  { %1201 = vmatprep.subr.mxu1 %v2944_v19  ;;  %1272 = vmatprep.subr.mxu0 %v2962_v23  ;;  %v4434_v19 = vld [vmem:[#allocation28_spill] sm:$0xff]  ;;  %4435 = vst [vmem:[#allocation9_spill] sm:$0xff] %v3541_v21 }
 0x38a   :  { %1202 = vmatpush1.msra.mxu1 %v2956_v22  ;;  %1273 = vmatpush1.msra.mxu0 %v2976_v26  ;;  %v3547_v22 = vld [vmem:[%s4245_s6 + $0x1f8] sm:$0xff] }
 0x38b   :  { %1203 = vmatprep.subr.mxu1 %v2969_v24  ;;  %1274 = vmatprep.subr.mxu0 %v2991_v29  ;;  %4436 = vst [vmem:[#allocation11_spill] sm:$0xff] %v3547_v22  ;;  %v4437_v24 = vld [vmem:[#allocation33_spill] sm:$0xff] }
 0x38c   :  { %1204 = vmatpush1.msra.mxu1 %v2984_v28  ;;  %1275 = vmatpush1.msra.mxu0 %v3003_v32 }
 0x38d   :  { %1205 = vmatprep.subr.mxu1 %v2996_v30  ;;  %1276 = vmatprep.subr.mxu0 %v3014_v34  ;;  %v4438_v30 = vld [vmem:[#allocation35_spill] sm:$0xff] }
 0x38e   :  { %1206 = vmatpush1.msra.mxu1 %v3008_v33  ;;  %1277 = vmatpush1.msra.mxu0 %v3028_v39 }
 0x38f   :  { %1207 = vmatprep.subr.mxu1 %v3021_v37  ;;  %1278 = vmatprep.subr.mxu0 %v3043_v44 }
 0x390   :  { %1208 = vmatpush1.msra.mxu1 %v3036_v43  ;;  %1279 = vmatpush1.msra.mxu0 %v3055_v46 }
 0x391   :  { %1209 = vmatprep.subr.mxu1 %v3048_v35  ;;  %1280 = vmatprep.subr.mxu0 %v3066_v48 }
 0x392   :  { %1210 = vmatpush1.msra.mxu1 %v3060_v47  ;;  %1281 = vmatpush1.msra.mxu0 %v3080_v51 }
 0x393   :  { %1211 = vmatprep.subr.mxu1 %v3073_v49  ;;  %1282 = vmatprep.subr.mxu0 %v3095_v58 }
 0x394   :  { %1212 = vmatpush1.msra.mxu1 %v3088_v57  ;;  %1283 = vmatpush1.msra.mxu0 %v3107_v0 }
 0x395   :  { %1213 = vmatprep.subr.mxu1 %v4390_v31  ;;  %1284 = vmatprep.subr.mxu0 %v4391_v27 }
 0x396   :  { %1214 = vmatpush1.msra.mxu1 %v4392_v14  ;;  %1285 = vmatpush1.msra.mxu0 %v4417_v59 }
 0x397   :  { %1215 = vmatprep.subr.mxu1 %v4418_v60  ;;  %1286 = vmatprep.subr.mxu0 %v4419_v62 }
 0x398   :  { %1216 = vmatpush1.msra.mxu1 %v4420_v63  ;;  %1287 = vmatpush1.msra.mxu0 %v4421_v1 }
 0x399   :  { %1217 = vmatprep.subr.mxu1 %v4422_v2  ;;  %1288 = vmatprep.subr.mxu0 %v4423_v5 }
 0x39a   :  { %1218 = vmatpush1.msra.mxu1 %v4424_v6  ;;  %1289 = vmatpush1.msra.mxu0 %v4425_v7 }
 0x39b   :  { %1219 = vmatprep.subr.mxu1 %v4426_v8  ;;  %1290 = vmatprep.subr.mxu0 %v4427_v10 }
 0x39c   :  { %1220 = vmatpush1.msra.mxu1 %v4428_v11  ;;  %1291 = vmatpush1.msra.mxu0 %v4429_v12 }
 0x39d   :  { %1221 = vmatprep.subr.mxu1 %v4430_v13  ;;  %1292 = vmatprep.subr.mxu0 %v4431_v15 }
 0x39e   :  { %1222 = vmatpush1.msra.mxu1 %v4432_v17  ;;  %1255 = vmatprep.mubr.f32.mxu1 %v4433_v18 }
 0x39f   :  { %1293 = vmatpush1.msra.mxu0 %v4434_v19  ;;  %1326 = vmatprep.mubr.f32.mxu0 %v4433_v18 }
 0x3a0   :  { %1365 = vmatprep.subr.mxu1 %v3541_v21  ;;  %1436 = vmatprep.subr.mxu0 %v3547_v22 }
 0x43f   :  { %v1083_v23 = vpop.f32.mrf.mxu1  ;;  %v1154_v33 = vpop.f32.mrf.mxu0 }
 0x440   :  { %v1159_v26 = vadd.f32 %v1083_v23, %v4437_v24  ;;  %v1161_v41 = vadd.f32 %v1154_v33, %v4440_v9  ;;  %v3597_v33 = vld [vmem:[%s4245_s6 + $0x1a8] sm:$0xff]  ;;  %v3627_v9 = vld [vmem:[%s4245_s6 + $0x198] sm:$0xff] }
 0x441   :  { %v1085_v28 = vpop.f32.mrf.mxu1  ;;  %v1156_v37 = vpop.f32.mrf.mxu0 }
 0x442   :  { %v2181_v29 = vmul.f32 -1.442695, %v1159_v26  ;;  %v1160_v32 = vadd.f32 %v1085_v28, %v4438_v30  ;;  %v1162_v50 = vadd.f32 %v1156_v37, %v4439_v61  ;;  %v3561_v26 = vld [vmem:[%s4245_s6 + $0x1e0] sm:$0xff]  ;;  %v3573_v28 = vld [vmem:[%s4245_s6 + $0x1c8] sm:$0xff]  ;;  %v3615_v61 = vld [vmem:[%s4245_s6 + $0x1b0] sm:$0xff] }
 0x443   :  { %v3585_v30 = vld [vmem:[%s4245_s6 + $0x1c0] sm:$0xff] }
 0x444   :  { %2313 = vpow2.f32 %v2181_v29  ;;  %v2182_v34 = vmul.f32 -1.442695, %v1160_v32  ;;  %v2183_v42 = vmul.f32 -1.442695, %v1162_v50  ;;  %v3579_v29 = vld [vmem:[%s4245_s6 + $0x1d8] sm:$0xff]  ;;  %v3591_v32 = vld [vmem:[%s4245_s6 + $0x1d0] sm:$0xff] }
 0x445   :  { %v3609_v37 = vld [vmem:[%s4245_s6 + $0x1a0] sm:$0xff]  ;;  %v3621_v50 = vld [vmem:[%s4245_s6 + $0x188] sm:$0xff] }
 0x446   :  { %2315 = vpow2.f32 %v2182_v34  ;;  %v3603_v34 = vld [vmem:[%s4245_s6 + $0x1b8] sm:$0xff] }
 0x447   :  { %2317 = vtanh.f32 %v1161_v41  ;;  %v3633_v41 = vld [vmem:[%s4245_s6 + $0x180] sm:$0xff] }
 0x448   :  { %2319 = vpow2.f32 %v2183_v42  ;;  %v3639_v42 = vld [vmem:[%s4245_s6 + $0x190] sm:$0xff] }
 0x451   :  { %v2314_v36 = vpop.eup %2313 }
 0x452   :  { %v1166_v38 = vadd.f32 1.0, %v2314_v36  ;;  %v3645_v36 = vld [vmem:[%s4245_s6 + $0x168] sm:$0xff] }
 0x453   :  { %v2316_v53 = vpop.eup %2315 }
 0x454   :  { %2321 = vrcp.f32 %v1166_v38  ;;  %v1172_v3 = vadd.f32 1.0, %v2316_v53  ;;  %v2318_v4 = vpop.eup %2317  ;;  %v3651_v38 = vld [vmem:[%s4245_s6 + $0x178] sm:$0xff]  ;;  %v3657_v53 = vld [vmem:[%s4245_s6 + $0x160] sm:$0xff] }
 0x455   :  { %v2320_v45 = vpop.eup %2319 }
 0x456   :  { %2323 = vrcp.f32 %v1172_v3  ;;  %v1179_v54 = vadd.f32 1.0, %v2320_v45  ;;  %v3663_v3 = vld [vmem:[%s4245_s6 + $0x170] sm:$0xff]  ;;  %v3675_v45 = vld [vmem:[%s4245_s6 + $0x158] sm:$0xff] }
 0x458   :  { %2325 = vrcp.f32 %v1179_v54  ;;  %v3699_v54 = vld [vmem:[%s4245_s6 + $0x138] sm:$0xff] }
 0x461   :  { %v2322_v16 = vpop.eup %2321 }
 0x462   :  { %v1183_v55 = vmul.f32 %v2322_v16, %v2318_v4  ;;  %v3669_v4 = vld [vmem:[%s4245_s6 + $0x148] sm:$0xff]  ;;  %v3681_v16 = vld [vmem:[%s4245_s6 + $0x140] sm:$0xff] }
 0x463   :  { %v2324_v25 = vpop.eup %2323 }
 0x464   :  { %v1182_v52 = vmul.f32 %v2324_v25, %v3471_v40  ;;  %v3567_v40 = vld [vmem:[%s4245_s6 + $0x1f0] sm:$0xff]  ;;  %v3693_v25 = vld [vmem:[%s4245_s6 + $0x128] sm:$0xff] }
 0x465   :  { %v2326_v56 = vpop.eup %2325 }
 0x466   :  { %v3555_v20 = vadd.f32 %v1183_v55, %v1182_v52  ;;  %v3687_v55 = vld [vmem:[%s4245_s6 + $0x150] sm:$0xff]  ;;  %v3705_v52 = vld [vmem:[%s4245_s6 + $0x120] sm:$0xff] }
 0x467   :  { %4441 = vst [vmem:[#allocation10_spill] sm:$0xff] %v3705_v52 }
 0x468   :  { %2327 = vtanh.f32 %v3555_v20 }
 0x475   :  { %v2328_v23 = vpop.eup %2327 }
 0x476   :  { %v1186_v24 = vmul.f32 %v2328_v23, %v2326_v56  ;;  %v3711_v56 = vld [vmem:[%s4245_s6 + $0x130] sm:$0xff]  ;;  %v3717_v23 = vld [vmem:[%s4245_s6 + $0x108] sm:$0xff] }
 0x477   :  { %4442 = vst [vmem:[#allocation7_spill] sm:$0xff] %v3717_v23 }
 0x478   :  { %1256 = vmatmul.mubr.f32.vlgmr.msra.gmra.mxu1 %v1186_v24  ;;  %1327 = vmatmul.mubr.f32.vlgmr.msra.gmra.mxu0 %v1186_v24  ;;  %v3723_v24 = vld [vmem:[%s4245_s6 + $0x118] sm:$0xff] }
 0x479   :  { %1366 = vmatpush1.msra.mxu1 %v3561_v26  ;;  %1437 = vmatpush1.msra.mxu0 %v3567_v40 }
 0x47a   :  { %1367 = vmatprep.subr.mxu1 %v3573_v28  ;;  %1438 = vmatprep.subr.mxu0 %v3579_v29 }
 0x47b   :  { %1368 = vmatpush1.msra.mxu1 %v3585_v30  ;;  %1439 = vmatpush1.msra.mxu0 %v3591_v32 }
 0x47c   :  { %1369 = vmatprep.subr.mxu1 %v3597_v33  ;;  %1440 = vmatprep.subr.mxu0 %v3603_v34 }
 0x47d   :  { %1370 = vmatpush1.msra.mxu1 %v3609_v37  ;;  %1441 = vmatpush1.msra.mxu0 %v3615_v61 }
 0x47e   :  { %1371 = vmatprep.subr.mxu1 %v3621_v50  ;;  %1442 = vmatprep.subr.mxu0 %v3627_v9 }
 0x47f   :  { %1372 = vmatpush1.msra.mxu1 %v3633_v41  ;;  %1443 = vmatpush1.msra.mxu0 %v3639_v42 }
 0x480   :  { %1373 = vmatprep.subr.mxu1 %v3645_v36  ;;  %1444 = vmatprep.subr.mxu0 %v3651_v38 }
 0x481   :  { %1374 = vmatpush1.msra.mxu1 %v3657_v53  ;;  %1445 = vmatpush1.msra.mxu0 %v3663_v3 }
 0x482   :  { %1375 = vmatprep.subr.mxu1 %v3669_v4  ;;  %1446 = vmatprep.subr.mxu0 %v3675_v45 }
 0x483   :  { %1376 = vmatpush1.msra.mxu1 %v3681_v16  ;;  %1447 = vmatpush1.msra.mxu0 %v3687_v55 }
 0x484   :  { %1377 = vmatprep.subr.mxu1 %v3693_v25  ;;  %1448 = vmatprep.subr.mxu0 %v3699_v54 }
 0x485   :  { %1378 = vmatpush1.msra.mxu1 %v3705_v52  ;;  %1449 = vmatpush1.msra.mxu0 %v3711_v56  ;;  %v3729_v52 = vld [vmem:[%s4245_s6 + $0x100] sm:$0xff] }
 0x486   :  { %1379 = vmatprep.subr.mxu1 %v3717_v23  ;;  %1450 = vmatprep.subr.mxu0 %v3723_v24  ;;  %v3736_v23 = vld [vmem:[%s4245_s6 + $0xe8] sm:$0xff] }
 0x487   :  { %1380 = vmatpush1.msra.mxu1 %v3729_v52  ;;  %1451 = vmatpush1.msra.mxu0 %v3028_v39 }
 0x488   :  { %1381 = vmatprep.subr.mxu1 %v3736_v23  ;;  %1452 = vmatprep.subr.mxu0 %v3043_v44 }
 0x489   :  { %1382 = vmatpush1.msra.mxu1 %v3036_v43  ;;  %1453 = vmatpush1.msra.mxu0 %v3055_v46  ;;  %v4443_v43 = vld [vmem:[#allocation37_spill] sm:$0xff] }
 0x48a   :  { %1383 = vmatprep.subr.mxu1 %v3048_v35  ;;  %1454 = vmatprep.subr.mxu0 %v3066_v48 }
 0x48b   :  { %1384 = vmatpush1.msra.mxu1 %v3060_v47  ;;  %1455 = vmatpush1.msra.mxu0 %v3080_v51  ;;  %v4444_v47 = vld [vmem:[#allocation39_spill] sm:$0xff] }
 0x48c   :  { %1385 = vmatprep.subr.mxu1 %v3073_v49  ;;  %1456 = vmatprep.subr.mxu0 %v3095_v58  ;;  %v4445_v58 = vld [vmem:[#allocation40_spill] sm:$0xff] }
 0x48d   :  { %1386 = vmatpush1.msra.mxu1 %v3088_v57  ;;  %1457 = vmatpush1.msra.mxu0 %v3107_v0 }
 0x48e   :  { %1387 = vmatprep.subr.mxu1 %v4390_v31  ;;  %1458 = vmatprep.subr.mxu0 %v4391_v27  ;;  %v4446_v31 = vld [vmem:[#allocation38_spill] sm:$0xff] }
 0x48f   :  { %1388 = vmatpush1.msra.mxu1 %v4392_v14  ;;  %1459 = vmatpush1.msra.mxu0 %v4417_v59 }
 0x490   :  { %1389 = vmatprep.subr.mxu1 %v4418_v60  ;;  %1460 = vmatprep.subr.mxu0 %v4419_v62 }
 0x491   :  { %1390 = vmatpush1.msra.mxu1 %v4420_v63  ;;  %1461 = vmatpush1.msra.mxu0 %v4421_v1 }
 0x492   :  { %1391 = vmatprep.subr.mxu1 %v4422_v2  ;;  %1462 = vmatprep.subr.mxu0 %v4423_v5 }
 0x493   :  { %1392 = vmatpush1.msra.mxu1 %v4424_v6  ;;  %1463 = vmatpush1.msra.mxu0 %v4425_v7 }
 0x494   :  { %1393 = vmatprep.subr.mxu1 %v4426_v8  ;;  %1464 = vmatprep.subr.mxu0 %v4427_v10 }
 0x495   :  { %1394 = vmatpush1.msra.mxu1 %v4428_v11  ;;  %1465 = vmatpush1.msra.mxu0 %v4429_v12 }
 0x496   :  { %1395 = vmatprep.subr.mxu1 %v4430_v13  ;;  %1466 = vmatprep.subr.mxu0 %v4431_v15 }
 0x497   :  { %1396 = vmatpush1.msra.mxu1 %v4432_v17  ;;  %1429 = vmatprep.mubr.f32.mxu1 %v4433_v18  ;;  %v4447_v17 = vld [vmem:[#allocation10_spill] sm:$0xff] }
 0x498   :  { %1467 = vmatpush1.msra.mxu0 %v4434_v19  ;;  %1500 = vmatprep.mubr.f32.mxu0 %v4433_v18  ;;  %v4448_v19 = vld [vmem:[#allocation7_spill] sm:$0xff] }
 0x499   :  { %1539 = vmatprep.subr.mxu1 %v3541_v21  ;;  %1610 = vmatprep.subr.mxu0 %v3547_v22 }
 0x538   :  { %v1257_v39 = vpop.f32.mrf.mxu1  ;;  %v1328_v49 = vpop.f32.mrf.mxu0 }
 0x539   :  { %v1333_v44 = vadd.f32 %v1257_v39, %v4443_v43  ;;  %v1335_v27 = vadd.f32 %v1328_v49, %v4446_v31  ;;  %v3821_v39 = vld [vmem:[%s4245_s6 + $0xf8] sm:$0xff]  ;;  %v3827_v43 = vld [vmem:[%s4245_s6 + $0xe0] sm:$0xff]  ;;  %v3863_v49 = vld [vmem:[%s4245_s6 + $0xa8] sm:$0xff] }
 0x53a   :  { %v1259_v35 = vpop.f32.mrf.mxu1  ;;  %v1330_v57 = vpop.f32.mrf.mxu0  ;;  %v3893_v31 = vld [vmem:[%s4245_s6 + $0x98] sm:$0xff] }
 0x53b   :  { %v2184_v46 = vmul.f32 -1.442695, %v1333_v44  ;;  %v1334_v48 = vadd.f32 %v1259_v35, %v4444_v47  ;;  %v1336_v0 = vadd.f32 %v1330_v57, %v4445_v58  ;;  %v3833_v44 = vld [vmem:[%s4245_s6 + $0xf0] sm:$0xff]  ;;  %v3839_v35 = vld [vmem:[%s4245_s6 + $0xc8] sm:$0xff]  ;;  %v3851_v47 = vld [vmem:[%s4245_s6 + $0xc0] sm:$0xff] }
 0x53c   :  { %v3875_v57 = vld [vmem:[%s4245_s6 + $0xa0] sm:$0xff]  ;;  %v3881_v58 = vld [vmem:[%s4245_s6 + $0xb0] sm:$0xff] }
 0x53d   :  { %2329 = vpow2.f32 %v2184_v46  ;;  %v2185_v51 = vmul.f32 -1.442695, %v1334_v48  ;;  %v2186_v14 = vmul.f32 -1.442695, %v1336_v0  ;;  %v3845_v46 = vld [vmem:[%s4245_s6 + $0xd8] sm:$0xff]  ;;  %v3857_v48 = vld [vmem:[%s4245_s6 + $0xd0] sm:$0xff] }
 0x53e   :  { %v3887_v0 = vld [vmem:[%s4245_s6 + $0x88] sm:$0xff] }
 0x53f   :  { %2331 = vpow2.f32 %v2185_v51  ;;  %v3869_v51 = vld [vmem:[%s4245_s6 + $0xb8] sm:$0xff] }
 0x540   :  { %2333 = vtanh.f32 %v1335_v27  ;;  %v3899_v27 = vld [vmem:[%s4245_s6 + $0x80] sm:$0xff] }
 0x541   :  { %2335 = vpow2.f32 %v2186_v14  ;;  %v3905_v14 = vld [vmem:[%s4245_s6 + $0x90] sm:$0xff] }
 0x542   :  { %4449 = vst [vmem:[#allocation8_spill] sm:$0xff] %v3905_v14 }
 0x54a   :  { %v2330_v59 = vpop.eup %2329 }
 0x54b   :  { %v1340_v60 = vadd.f32 1.0, %v2330_v59  ;;  %v3911_v59 = vld [vmem:[%s4245_s6 + $0x68] sm:$0xff] }
 0x54c   :  { %v2332_v62 = vpop.eup %2331  ;;  %4450 = vst [vmem:[#allocation29_spill] sm:$0xff] %v3911_v59 }
 0x54d   :  { %2337 = vrcp.f32 %v1340_v60  ;;  %v1346_v63 = vadd.f32 1.0, %v2332_v62  ;;  %v2334_v1 = vpop.eup %2333  ;;  %v3917_v60 = vld [vmem:[%s4245_s6 + $0x78] sm:$0xff]  ;;  %v3923_v62 = vld [vmem:[%s4245_s6 + $0x60] sm:$0xff] }
 0x54e   :  { %v2336_v2 = vpop.eup %2335  ;;  %4451 = vst [vmem:[#allocation31_spill] sm:$0xff] %v3917_v60  ;;  %4452 = vst [vmem:[#allocation32_spill] sm:$0xff] %v3923_v62 }
 0x54f   :  { %2339 = vrcp.f32 %v1346_v63  ;;  %v1353_v8 = vadd.f32 1.0, %v2336_v2  ;;  %v3929_v63 = vld [vmem:[%s4245_s6 + $0x70] sm:$0xff]  ;;  %v3941_v2 = vld [vmem:[%s4245_s6 + $0x58] sm:$0xff] }
 0x550   :  { %4453 = vst [vmem:[#allocation30_spill] sm:$0xff] %v3929_v63  ;;  %4455 = vst [vmem:[#allocation12_spill] sm:$0xff] %v3941_v2 }
 0x551   :  { %2341 = vrcp.f32 %v1353_v8  ;;  %v3965_v8 = vld [vmem:[%s4245_s6 + $0x38] sm:$0xff] }
 0x552   :  { %4459 = vst [vmem:[#allocation16_spill] sm:$0xff] %v3965_v8 }
 0x55a   :  { %v2338_v5 = vpop.eup %2337 }
 0x55b   :  { %v1357_v6 = vmul.f32 %v2338_v5, %v2334_v1  ;;  %v3935_v1 = vld [vmem:[%s4245_s6 + $0x48] sm:$0xff]  ;;  %v3947_v5 = vld [vmem:[%s4245_s6 + $0x40] sm:$0xff] }
 0x55c   :  { %v2340_v7 = vpop.eup %2339  ;;  %4454 = vst [vmem:[#allocation13_spill] sm:$0xff] %v3935_v1  ;;  %4456 = vst [vmem:[#allocation15_spill] sm:$0xff] %v3947_v5 }
 0x55d   :  { %v1356_v10 = vmul.f32 %v2340_v7, %v3555_v20  ;;  %v3814_v20 = vld [vmem:[%s4245_s6 + $0x110] sm:$0xff]  ;;  %v3959_v7 = vld [vmem:[%s4245_s6 + $0x28] sm:$0xff] }
 0x55e   :  { %v2342_v12 = vpop.eup %2341  ;;  %4458 = vst [vmem:[#allocation17_spill] sm:$0xff] %v3959_v7 }
 0x55f   :  { %v3779_v11 = vadd.f32 %v1357_v6, %v1356_v10  ;;  %v3953_v6 = vld [vmem:[%s4245_s6 + $0x50] sm:$0xff]  ;;  %v3971_v10 = vld [vmem:[%s4245_s6 + $0x20] sm:$0xff] }
 0x560   :  { %4457 = vst [vmem:[#allocation14_spill] sm:$0xff] %v3953_v6  ;;  %4460 = vst [vmem:[#allocation19_spill] sm:$0xff] %v3971_v10 }
 0x561   :  { %2343 = vtanh.f32 %v3779_v11 }
 0x56e   :  { %v2344_v13 = vpop.eup %2343 }
 0x56f   :  { %v1360_v15 = vmul.f32 %v2344_v13, %v2342_v12  ;;  %v3977_v12 = vld [vmem:[%s4245_s6 + $0x30] sm:$0xff]  ;;  %v3983_v13 = vld [vmem:[%s4245_s6 + $0x8] sm:$0xff] }
 0x570   :  { %4461 = vst [vmem:[#allocation18_spill] sm:$0xff] %v3977_v12  ;;  %4462 = vst [vmem:[#allocation21_spill] sm:$0xff] %v3983_v13 }
 0x571   :  { %1430 = vmatmul.mubr.f32.vlgmr.msra.gmra.mxu1 %v1360_v15  ;;  %1501 = vmatmul.mubr.f32.vlgmr.msra.gmra.mxu0 %v1360_v15  ;;  %v3989_v15 = vld [vmem:[%s4245_s6 + $0x18] sm:$0xff] }
 0x572   :  { %1540 = vmatpush1.msra.mxu1 %v3561_v26  ;;  %1611 = vmatpush1.msra.mxu0 %v3567_v40  ;;  %4463 = vst [vmem:[#allocation20_spill] sm:$0xff] %v3989_v15 }
 0x573   :  { %1541 = vmatprep.subr.mxu1 %v3573_v28  ;;  %1612 = vmatprep.subr.mxu0 %v3579_v29 }
 0x574   :  { %1542 = vmatpush1.msra.mxu1 %v3585_v30  ;;  %1613 = vmatpush1.msra.mxu0 %v3591_v32 }
 0x575   :  { %1543 = vmatprep.subr.mxu1 %v3597_v33  ;;  %1614 = vmatprep.subr.mxu0 %v3603_v34 }
 0x576   :  { %1544 = vmatpush1.msra.mxu1 %v3609_v37  ;;  %1615 = vmatpush1.msra.mxu0 %v3615_v61 }
 0x577   :  { %1545 = vmatprep.subr.mxu1 %v3621_v50  ;;  %1616 = vmatprep.subr.mxu0 %v3627_v9 }
 0x578   :  { %1546 = vmatpush1.msra.mxu1 %v3633_v41  ;;  %1617 = vmatpush1.msra.mxu0 %v3639_v42 }
 0x579   :  { %1547 = vmatprep.subr.mxu1 %v3645_v36  ;;  %1618 = vmatprep.subr.mxu0 %v3651_v38 }
 0x57a   :  { %1548 = vmatpush1.msra.mxu1 %v3657_v53  ;;  %1619 = vmatpush1.msra.mxu0 %v3663_v3 }
 0x57b   :  { %1549 = vmatprep.subr.mxu1 %v3669_v4  ;;  %1620 = vmatprep.subr.mxu0 %v3675_v45 }
 0x57c   :  { %1550 = vmatpush1.msra.mxu1 %v3681_v16  ;;  %1621 = vmatpush1.msra.mxu0 %v3687_v55 }
 0x57d   :  { %1551 = vmatprep.subr.mxu1 %v3693_v25  ;;  %1622 = vmatprep.subr.mxu0 %v3699_v54 }
 0x57e   :  { %1552 = vmatpush1.msra.mxu1 %v4447_v17  ;;  %1623 = vmatpush1.msra.mxu0 %v3711_v56 }
 0x57f   :  { %1553 = vmatprep.subr.mxu1 %v4448_v19  ;;  %1624 = vmatprep.subr.mxu0 %v3723_v24 }
 0x580   :  { %1554 = vmatpush1.msra.mxu1 %v3729_v52  ;;  %1625 = vmatpush1.msra.mxu0 %v3814_v20 }
 0x581   :  { %1555 = vmatprep.subr.mxu1 %v3736_v23  ;;  %1626 = vmatprep.subr.mxu0 %v3821_v39 }
 0x582   :  { %1556 = vmatpush1.msra.mxu1 %v3827_v43  ;;  %1627 = vmatpush1.msra.mxu0 %v3833_v44 }
 0x583   :  { %1557 = vmatprep.subr.mxu1 %v3839_v35  ;;  %1628 = vmatprep.subr.mxu0 %v3845_v46 }
 0x584   :  { %1558 = vmatpush1.msra.mxu1 %v3851_v47  ;;  %1629 = vmatpush1.msra.mxu0 %v3857_v48 }
 0x585   :  { %1559 = vmatprep.subr.mxu1 %v3863_v49  ;;  %1630 = vmatprep.subr.mxu0 %v3869_v51 }
 0x586   :  { %1560 = vmatpush1.msra.mxu1 %v3875_v57  ;;  %1631 = vmatpush1.msra.mxu0 %v3881_v58 }
 0x587   :  { %1561 = vmatprep.subr.mxu1 %v3887_v0  ;;  %1632 = vmatprep.subr.mxu0 %v3893_v31 }
 0x588   :  { %1562 = vmatpush1.msra.mxu1 %v3899_v27  ;;  %1633 = vmatpush1.msra.mxu0 %v3905_v14 }
 0x589   :  { %1563 = vmatprep.subr.mxu1 %v3911_v59  ;;  %1634 = vmatprep.subr.mxu0 %v3917_v60  ;;  %v4469_v60 = vld [vmem:[#allocation42_spill] sm:$0xff] }
 0x58a   :  { %1564 = vmatpush1.msra.mxu1 %v3923_v62  ;;  %1635 = vmatpush1.msra.mxu0 %v3929_v63  ;;  %v4468_v62 = vld [vmem:[#allocation44_spill] sm:$0xff] }
 0x58b   :  { %1565 = vmatprep.subr.mxu1 %v3935_v1  ;;  %1636 = vmatprep.subr.mxu0 %v3941_v2 }
 0x58c   :  { %1566 = vmatpush1.msra.mxu1 %v3947_v5  ;;  %1637 = vmatpush1.msra.mxu0 %v3953_v6  ;;  %v4467_v6 = vld [vmem:[#allocation43_spill] sm:$0xff] }
 0x58d   :  { %1567 = vmatprep.subr.mxu1 %v3959_v7  ;;  %1638 = vmatprep.subr.mxu0 %v3965_v8 }
 0x58e   :  { %1568 = vmatpush1.msra.mxu1 %v3971_v10  ;;  %1639 = vmatpush1.msra.mxu0 %v3977_v12  ;;  %v3995_v10 = vld [vmem:[%s4245_s6] sm:$0xff]  ;;  %v4466_v12 = vld [vmem:[#allocation41_spill] sm:$0xff] }
 0x58f   :  { %1569 = vmatprep.subr.mxu1 %v3983_v13  ;;  %1640 = vmatprep.subr.mxu0 %v3989_v15  ;;  %4464 = vst [vmem:[#allocation23_spill] sm:$0xff] %v3995_v10  ;;  %v4002_v13 = vld [vmem:[%s4245_s6 + $0x10] sm:$0xff] }
 0x590   :  { %1570 = vmatpush1.msra.mxu1 %v3995_v10  ;;  %1603 = vmatprep.mubr.f32.mxu1 %v4433_v18  ;;  %4465 = vst [vmem:[#allocation22_spill] sm:$0xff] %v4002_v13 }
 0x591   :  { %1641 = vmatpush1.msra.mxu0 %v4002_v13  ;;  %1674 = vmatprep.mubr.f32.mxu0 %v4433_v18 }
 0x592   :  { %1713 = vmatprep.subr.mxu1 %v3541_v21  ;;  %1784 = vmatprep.subr.mxu0 %v3547_v22 }
 0x631   :  { %v1431_v15 = vpop.f32.mrf.mxu1  ;;  %v1502_v2 = vpop.f32.mrf.mxu0 }
 0x632   :  { %v1507_v8 = vadd.f32 %v1431_v15, %v4466_v12  ;;  %v1509_v18 = vadd.f32 %v1502_v2, %v4469_v60  ;;  %v4475_v2 = vld [vmem:[#allocation13_spill] sm:$0xff] }
 0x633   :  { %v1433_v7 = vpop.f32.mrf.mxu1  ;;  %v1504_v63 = vpop.f32.mrf.mxu0 }
 0x634   :  { %v2187_v10 = vmul.f32 -1.442695, %v1507_v8  ;;  %v1508_v5 = vadd.f32 %v1433_v7, %v4467_v6  ;;  %v1510_v13 = vadd.f32 %v1504_v63, %v4468_v62  ;;  %v4474_v63 = vld [vmem:[#allocation30_spill] sm:$0xff] }
 0x636   :  { %2345 = vpow2.f32 %v2187_v10  ;;  %v2188_v1 = vmul.f32 -1.442695, %v1508_v5  ;;  %v2189_v59 = vmul.f32 -1.442695, %v1510_v13  ;;  %v4476_v13 = vld [vmem:[#allocation12_spill] sm:$0xff] }
 0x638   :  { %2347 = vpow2.f32 %v2188_v1 }
 0x639   :  { %2349 = vtanh.f32 %v1509_v18 }
 0x63a   :  { %2351 = vpow2.f32 %v2189_v59  ;;  %v4473_v59 = vld [vmem:[#allocation32_spill] sm:$0xff] }
 0x643   :  { %v2346_v21 = vpop.eup %2345 }
 0x644   :  { %v1514_v14 = vadd.f32 1.0, %v2346_v21 }
 0x645   :  { %v2348_v22 = vpop.eup %2347 }
 0x646   :  { %2353 = vrcp.f32 %v1514_v14  ;;  %v1520_v12 = vadd.f32 1.0, %v2348_v22  ;;  %v2350_v8 = vpop.eup %2349  ;;  %v4470_v22 = vld [vmem:[#allocation8_spill] sm:$0xff]  ;;  %v4472_v14 = vld [vmem:[#allocation31_spill] sm:$0xff] }
 0x647   :  { %v2352_v6 = vpop.eup %2351 }
 0x648   :  { %2355 = vrcp.f32 %v1520_v12  ;;  %v1527_v1 = vadd.f32 1.0, %v2352_v6  ;;  %v4477_v12 = vld [vmem:[#allocation15_spill] sm:$0xff]  ;;  %v4479_v6 = vld [vmem:[#allocation17_spill] sm:$0xff] }
 0x64a   :  { %2357 = vrcp.f32 %v1527_v1  ;;  %v4483_v1 = vld [vmem:[#allocation21_spill] sm:$0xff] }
 0x653   :  { %v2354_v7 = vpop.eup %2353 }
 0x654   :  { %v1531_v10 = vmul.f32 %v2354_v7, %v2350_v8  ;;  %v4478_v8 = vld [vmem:[#allocation14_spill] sm:$0xff]  ;;  %v4480_v7 = vld [vmem:[#allocation16_spill] sm:$0xff] }
 0x655   :  { %v2356_v5 = vpop.eup %2355 }
 0x656   :  { %v1530_v15 = vmul.f32 %v2356_v5, %v3779_v11  ;;  %v4471_v11 = vld [vmem:[#allocation29_spill] sm:$0xff]  ;;  %v4482_v5 = vld [vmem:[#allocation18_spill] sm:$0xff] }
 0x657   :  { %v2358_v21 = vpop.eup %2357 }
 0x658   :  { %v4013_v62 = vadd.f32 %v1531_v10, %v1530_v15  ;;  %v4481_v10 = vld [vmem:[#allocation19_spill] sm:$0xff]  ;;  %v4484_v15 = vld [vmem:[#allocation20_spill] sm:$0xff] }
 0x65a   :  { %2359 = vtanh.f32 %v4013_v62 }
 0x667   :  { %v2360_v18 = vpop.eup %2359 }
 0x668   :  { %v1534_v60 = vmul.f32 %v2360_v18, %v2358_v21  ;;  %v4485_v21 = vld [vmem:[#allocation23_spill] sm:$0xff]  ;;  %v4486_v18 = vmov 0.0  }
 0x66a   :  { %1604 = vmatmul.mubr.f32.vlgmr.msra.gmra.mxu1 %v1534_v60  ;;  %1675 = vmatmul.mubr.f32.vlgmr.msra.gmra.mxu0 %v1534_v60  ;;  %v4487_v60 = vld [vmem:[#allocation22_spill] sm:$0xff] }
 0x66b   :  { %1714 = vmatpush1.msra.mxu1 %v3561_v26  ;;  %1785 = vmatpush1.msra.mxu0 %v3567_v40 }
 0x66c   :  { %1715 = vmatprep.subr.mxu1 %v3573_v28  ;;  %1786 = vmatprep.subr.mxu0 %v3579_v29 }
 0x66d   :  { %1716 = vmatpush1.msra.mxu1 %v3585_v30  ;;  %1787 = vmatpush1.msra.mxu0 %v3591_v32 }
 0x66e   :  { %1717 = vmatprep.subr.mxu1 %v3597_v33  ;;  %1788 = vmatprep.subr.mxu0 %v3603_v34 }
 0x66f   :  { %1718 = vmatpush1.msra.mxu1 %v3609_v37  ;;  %1789 = vmatpush1.msra.mxu0 %v3615_v61 }
 0x670   :  { %1719 = vmatprep.subr.mxu1 %v3621_v50  ;;  %1790 = vmatprep.subr.mxu0 %v3627_v9 }
 0x671   :  { %1720 = vmatpush1.msra.mxu1 %v3633_v41  ;;  %1791 = vmatpush1.msra.mxu0 %v3639_v42 }
 0x672   :  { %1721 = vmatprep.subr.mxu1 %v3645_v36  ;;  %1792 = vmatprep.subr.mxu0 %v3651_v38 }
 0x673   :  { %1722 = vmatpush1.msra.mxu1 %v3657_v53  ;;  %1793 = vmatpush1.msra.mxu0 %v3663_v3 }
 0x674   :  { %1723 = vmatprep.subr.mxu1 %v3669_v4  ;;  %1794 = vmatprep.subr.mxu0 %v3675_v45 }
 0x675   :  { %1724 = vmatpush1.msra.mxu1 %v3681_v16  ;;  %1795 = vmatpush1.msra.mxu0 %v3687_v55 }
 0x676   :  { %1725 = vmatprep.subr.mxu1 %v3693_v25  ;;  %1796 = vmatprep.subr.mxu0 %v3699_v54 }
 0x677   :  { %1726 = vmatpush1.msra.mxu1 %v4447_v17  ;;  %1797 = vmatpush1.msra.mxu0 %v3711_v56 }
 0x678   :  { %1727 = vmatprep.subr.mxu1 %v4448_v19  ;;  %1798 = vmatprep.subr.mxu0 %v3723_v24 }
 0x679   :  { %1728 = vmatpush1.msra.mxu1 %v3729_v52  ;;  %1799 = vmatpush1.msra.mxu0 %v3814_v20 }
 0x67a   :  { %1729 = vmatprep.subr.mxu1 %v3736_v23  ;;  %1800 = vmatprep.subr.mxu0 %v3821_v39 }
 0x67b   :  { %1730 = vmatpush1.msra.mxu1 %v3827_v43  ;;  %1801 = vmatpush1.msra.mxu0 %v3833_v44 }
 0x67c   :  { %1731 = vmatprep.subr.mxu1 %v3839_v35  ;;  %1802 = vmatprep.subr.mxu0 %v3845_v46 }
 0x67d   :  { %1732 = vmatpush1.msra.mxu1 %v3851_v47  ;;  %1803 = vmatpush1.msra.mxu0 %v3857_v48 }
 0x67e   :  { %1733 = vmatprep.subr.mxu1 %v3863_v49  ;;  %1804 = vmatprep.subr.mxu0 %v3869_v51 }
 0x67f   :  { %1734 = vmatpush1.msra.mxu1 %v3875_v57  ;;  %1805 = vmatpush1.msra.mxu0 %v3881_v58 }
 0x680   :  { %1735 = vmatprep.subr.mxu1 %v3887_v0  ;;  %1806 = vmatprep.subr.mxu0 %v3893_v31 }
 0x681   :  { %1736 = vmatpush1.msra.mxu1 %v3899_v27  ;;  %1807 = vmatpush1.msra.mxu0 %v4470_v22 }
 0x682   :  { %1737 = vmatprep.subr.mxu1 %v4471_v11  ;;  %1808 = vmatprep.subr.mxu0 %v4472_v14  ;;  %v4493_v14 = vld [vmem:[#allocation46_spill] sm:$0xff] }
 0x683   :  { %1738 = vmatpush1.msra.mxu1 %v4473_v59  ;;  %1809 = vmatpush1.msra.mxu0 %v4474_v63  ;;  %v4492_v59 = vld [vmem:[#allocation48_spill] sm:$0xff] }
 0x684   :  { %1739 = vmatprep.subr.mxu1 %v4475_v2  ;;  %1810 = vmatprep.subr.mxu0 %v4476_v13 }
 0x685   :  { %1740 = vmatpush1.msra.mxu1 %v4477_v12  ;;  %1811 = vmatpush1.msra.mxu0 %v4478_v8  ;;  %v4488_v8 = vld [vmem:[#allocation9_spill] sm:$0xff] }
 0x686   :  { %1741 = vmatprep.subr.mxu1 %v4479_v6  ;;  %1812 = vmatprep.subr.mxu0 %v4480_v7  ;;  %v4489_v6 = vld [vmem:[#allocation11_spill] sm:$0xff] }
 0x687   :  { %1742 = vmatpush1.msra.mxu1 %v4481_v10  ;;  %1813 = vmatpush1.msra.mxu0 %v4482_v5  ;;  %v4490_v10 = vld [vmem:[#allocation45_spill] sm:$0xff] }
 0x688   :  { %1743 = vmatprep.subr.mxu1 %v4483_v1  ;;  %1814 = vmatprep.subr.mxu0 %v4484_v15  ;;  %v4491_v1 = vld [vmem:[#allocation47_spill] sm:$0xff] }
 0x689   :  { %1744 = vmatpush1.msra.mxu1 %v4485_v21  ;;  %1777 = vmatprep.mubr.f32.mxu1 %v4486_v18 }
 0x68a   :  { %1815 = vmatpush1.msra.mxu0 %v4487_v60  ;;  %1848 = vmatprep.mubr.f32.mxu0 %v4486_v18 }
 0x68b   :  { %1887 = vmatprep.subr.mxu1 %v4488_v8  ;;  %1958 = vmatprep.subr.mxu0 %v4489_v6 }
 0x72a   :  { %v1605_v7 = vpop.f32.mrf.mxu1  ;;  %v1676_v15 = vpop.f32.mrf.mxu0 }
 0x72b   :  { %v1681_v12 = vadd.f32 %v1605_v7, %v4490_v10  ;;  %v1683_v18 = vadd.f32 %v1676_v15, %v4493_v14 }
 0x72c   :  { %v1607_v5 = vpop.f32.mrf.mxu1  ;;  %v1678_v63 = vpop.f32.mrf.mxu0 }
 0x72d   :  { %v2190_v13 = vmul.f32 -1.442695, %v1681_v12  ;;  %v1682_v2 = vadd.f32 %v1607_v5, %v4491_v1  ;;  %v1684_v60 = vadd.f32 %v1678_v63, %v4492_v59 }
 0x72f   :  { %2361 = vpow2.f32 %v2190_v13  ;;  %v2191_v21 = vmul.f32 -1.442695, %v1682_v2  ;;  %v2192_v11 = vmul.f32 -1.442695, %v1684_v60  ;;  %v2071_v60 = vld [vmem:[%s4247_s8 + $0x70] sm:$0xff] }
 0x731   :  { %2363 = vpow2.f32 %v2191_v21 }
 0x732   :  { %2365 = vtanh.f32 %v1683_v18  ;;  %v2072_v18 = vld [vmem:[%s4247_s8 + $0x78] sm:$0xff] }
 0x733   :  { %2367 = vpow2.f32 %v2192_v11 }
 0x73c   :  { %v2362_v8 = vpop.eup %2361 }
 0x73d   :  { %v1688_v22 = vadd.f32 1.0, %v2362_v8  ;;  %v2070_v8 = vld [vmem:[%s4247_s8 + $0x68] sm:$0xff] }
 0x73e   :  { %v2364_v6 = vpop.eup %2363 }
 0x73f   :  { %2369 = vrcp.f32 %v1688_v22  ;;  %v1694_v7 = vadd.f32 1.0, %v2364_v6  ;;  %v2366_v12 = vpop.eup %2365  ;;  %v2069_v6 = vld [vmem:[%s4247_s8 + $0x60] sm:$0xff] }
 0x740   :  { %v2368_v10 = vpop.eup %2367 }
 0x741   :  { %2371 = vrcp.f32 %v1694_v7  ;;  %v1701_v1 = vadd.f32 1.0, %v2368_v10  ;;  %v2068_v7 = vld [vmem:[%s4247_s8 + $0x58] sm:$0xff]  ;;  %v2066_v10 = vld [vmem:[%s4247_s8 + $0x48] sm:$0xff] }
 0x743   :  { %2373 = vrcp.f32 %v1701_v1  ;;  %v2062_v1 = vld [vmem:[%s4247_s8 + $0x28] sm:$0xff] }
 0x74c   :  { %v2370_v13 = vpop.eup %2369 }
 0x74d   :  { %v1705_v5 = vmul.f32 %v2370_v13, %v2366_v12  ;;  %v2067_v12 = vld [vmem:[%s4247_s8 + $0x50] sm:$0xff]  ;;  %v2065_v13 = vld [vmem:[%s4247_s8 + $0x40] sm:$0xff] }
 0x74e   :  { %v2372_v2 = vpop.eup %2371 }
 0x74f   :  { %v1704_v21 = vmul.f32 %v2372_v2, %v4013_v62  ;;  %v2063_v2 = vld [vmem:[%s4247_s8 + $0x30] sm:$0xff] }
 0x750   :  { %v2374_v14 = vpop.eup %2373 }
 0x751   :  { %v4087_v59 = vadd.f32 %v1705_v5, %v1704_v21  ;;  %v2064_v5 = vld [vmem:[%s4247_s8 + $0x38] sm:$0xff]  ;;  %v2061_v21 = vld [vmem:[%s4247_s8 + $0x20] sm:$0xff] }
 0x753   :  { %2375 = vtanh.f32 %v4087_v59 }
 0x760   :  { %v2376_v63 = vpop.eup %2375 }
 0x761   :  { %v1708_v15 = vmul.f32 %v2376_v63, %v2374_v14  ;;  %v2059_v14 = vld [vmem:[%s4247_s8 + $0x10] sm:$0xff]  ;;  %v2058_v63 = vld [vmem:[%s4247_s8 + $0x8] sm:$0xff] }
 0x763   :  { %1778 = vmatmul.mubr.f32.vlgmr.msra.gmra.mxu1 %v1708_v15  ;;  %1849 = vmatmul.mubr.f32.vlgmr.msra.gmra.mxu0 %v1708_v15  ;;  %v2057_v15 = vld [vmem:[%s4247_s8] sm:$0xff] }
 0x764   :  { %1888 = vmatpush1.msra.mxu1 %v3561_v26  ;;  %1959 = vmatpush1.msra.mxu0 %v3567_v40  ;;  %v4494_v26 = vld [vmem:[#allocation8_spill] sm:$0xff]  ;;  %v4495_v40 = vld [vmem:[#allocation29_spill] sm:$0xff] }
 0x765   :  { %1889 = vmatprep.subr.mxu1 %v3573_v28  ;;  %1960 = vmatprep.subr.mxu0 %v3579_v29  ;;  %v4496_v28 = vld [vmem:[#allocation31_spill] sm:$0xff]  ;;  %v4497_v29 = vld [vmem:[#allocation32_spill] sm:$0xff] }
 0x766   :  { %1890 = vmatpush1.msra.mxu1 %v3585_v30  ;;  %1961 = vmatpush1.msra.mxu0 %v3591_v32  ;;  %v4498_v30 = vld [vmem:[#allocation30_spill] sm:$0xff]  ;;  %v4499_v32 = vld [vmem:[#allocation13_spill] sm:$0xff] }
 0x767   :  { %1891 = vmatprep.subr.mxu1 %v3597_v33  ;;  %1962 = vmatprep.subr.mxu0 %v3603_v34  ;;  %v4500_v33 = vld [vmem:[#allocation12_spill] sm:$0xff]  ;;  %v4501_v34 = vld [vmem:[#allocation15_spill] sm:$0xff] }
 0x768   :  { %1892 = vmatpush1.msra.mxu1 %v3609_v37  ;;  %1963 = vmatpush1.msra.mxu0 %v3615_v61  ;;  %v4502_v37 = vld [vmem:[#allocation14_spill] sm:$0xff]  ;;  %v4503_v61 = vld [vmem:[#allocation17_spill] sm:$0xff] }
 0x769   :  { %1893 = vmatprep.subr.mxu1 %v3621_v50  ;;  %1964 = vmatprep.subr.mxu0 %v3627_v9  ;;  %v4504_v50 = vld [vmem:[#allocation16_spill] sm:$0xff]  ;;  %v4505_v9 = vld [vmem:[#allocation19_spill] sm:$0xff] }
 0x76a   :  { %1894 = vmatpush1.msra.mxu1 %v3633_v41  ;;  %1965 = vmatpush1.msra.mxu0 %v3639_v42  ;;  %v4506_v41 = vld [vmem:[#allocation18_spill] sm:$0xff]  ;;  %v4507_v42 = vld [vmem:[#allocation21_spill] sm:$0xff] }
 0x76b   :  { %1895 = vmatprep.subr.mxu1 %v3645_v36  ;;  %1966 = vmatprep.subr.mxu0 %v3651_v38  ;;  %v4508_v36 = vld [vmem:[#allocation20_spill] sm:$0xff]  ;;  %v4509_v38 = vld [vmem:[#allocation23_spill] sm:$0xff] }
 0x76c   :  { %1896 = vmatpush1.msra.mxu1 %v3657_v53  ;;  %1967 = vmatpush1.msra.mxu0 %v3663_v3  ;;  %v4510_v53 = vmov 0.0   ;;  %v4511_v3 = vld [vmem:[#allocation22_spill] sm:$0xff] }
 0x76d   :  { %1897 = vmatprep.subr.mxu1 %v3669_v4  ;;  %1968 = vmatprep.subr.mxu0 %v3675_v45  ;;  %v4512_v45 = vld [vmem:[#allocation49_spill] sm:$0xff] }
 0x76e   :  { %1898 = vmatpush1.msra.mxu1 %v3681_v16  ;;  %1969 = vmatpush1.msra.mxu0 %v3687_v55 }
 0x76f   :  { %1899 = vmatprep.subr.mxu1 %v3693_v25  ;;  %1970 = vmatprep.subr.mxu0 %v3699_v54  ;;  %v4513_v54 = vld [vmem:[#allocation51_spill] sm:$0xff] }
 0x770   :  { %1900 = vmatpush1.msra.mxu1 %v4447_v17  ;;  %1971 = vmatpush1.msra.mxu0 %v3711_v56  ;;  %v4514_v17 = vld [vmem:[#allocation52_spill] sm:$0xff] }
 0x771   :  { %1901 = vmatprep.subr.mxu1 %v4448_v19  ;;  %1972 = vmatprep.subr.mxu0 %v3723_v24 }
 0x772   :  { %1902 = vmatpush1.msra.mxu1 %v3729_v52  ;;  %1973 = vmatpush1.msra.mxu0 %v3814_v20  ;;  %v4515_v20 = vld [vmem:[#allocation50_spill] sm:$0xff] }
 0x773   :  { %1903 = vmatprep.subr.mxu1 %v3736_v23  ;;  %1974 = vmatprep.subr.mxu0 %v3821_v39 }
 0x774   :  { %1904 = vmatpush1.msra.mxu1 %v3827_v43  ;;  %1975 = vmatpush1.msra.mxu0 %v3833_v44 }
 0x775   :  { %1905 = vmatprep.subr.mxu1 %v3839_v35  ;;  %1976 = vmatprep.subr.mxu0 %v3845_v46 }
 0x776   :  { %1906 = vmatpush1.msra.mxu1 %v3851_v47  ;;  %1977 = vmatpush1.msra.mxu0 %v3857_v48 }
 0x777   :  { %1907 = vmatprep.subr.mxu1 %v3863_v49  ;;  %1978 = vmatprep.subr.mxu0 %v3869_v51 }
 0x778   :  { %1908 = vmatpush1.msra.mxu1 %v3875_v57  ;;  %1979 = vmatpush1.msra.mxu0 %v3881_v58 }
 0x779   :  { %1909 = vmatprep.subr.mxu1 %v3887_v0  ;;  %1980 = vmatprep.subr.mxu0 %v3893_v31 }
 0x77a   :  { %1910 = vmatpush1.msra.mxu1 %v3899_v27  ;;  %1981 = vmatpush1.msra.mxu0 %v4494_v26 }
 0x77b   :  { %1911 = vmatprep.subr.mxu1 %v4495_v40  ;;  %1982 = vmatprep.subr.mxu0 %v4496_v28  ;;  %v4516_v40 = vld [vmem:[#allocation53_spill] sm:$0xff] }
 0x77c   :  { %1912 = vmatpush1.msra.mxu1 %v4497_v29  ;;  %1983 = vmatpush1.msra.mxu0 %v4498_v30 }
 0x77d   :  { %1913 = vmatprep.subr.mxu1 %v4499_v32  ;;  %1984 = vmatprep.subr.mxu0 %v4500_v33  ;;  %v4517_v32 = vld [vmem:[#allocation55_spill] sm:$0xff] }
 0x77e   :  { %1914 = vmatpush1.msra.mxu1 %v4501_v34  ;;  %1985 = vmatpush1.msra.mxu0 %v4502_v37 }
 0x77f   :  { %1915 = vmatprep.subr.mxu1 %v4503_v61  ;;  %1986 = vmatprep.subr.mxu0 %v4504_v50  ;;  %v4518_v50 = vld [vmem:[#allocation56_spill] sm:$0xff] }
 0x780   :  { %1916 = vmatpush1.msra.mxu1 %v4505_v9  ;;  %1987 = vmatpush1.msra.mxu0 %v4506_v41  ;;  %v4519_v41 = vld [vmem:[#allocation54_spill] sm:$0xff] }
 0x781   :  { %1917 = vmatprep.subr.mxu1 %v4507_v42  ;;  %1988 = vmatprep.subr.mxu0 %v4508_v36 }
 0x782   :  { %1918 = vmatpush1.msra.mxu1 %v4509_v38  ;;  %1951 = vmatprep.mubr.f32.mxu1 %v4510_v53 }
 0x783   :  { %1989 = vmatpush1.msra.mxu0 %v4511_v3  ;;  %2022 = vmatprep.mubr.f32.mxu0 %v4510_v53 }
 0x784   :  { %2243 = vmatprep.subr.mxu1 %v4510_v53 }
 0x823   :  { %v1779_v4 = vpop.f32.mrf.mxu1  ;;  %v1850_v56 = vpop.f32.mrf.mxu0 }
 0x824   :  { %v1855_v16 = vadd.f32 %v1779_v4, %v4512_v45  ;;  %v1857_v39 = vadd.f32 %v1850_v56, %v4515_v20  ;;  %v2199_v20 = vld [vmem:[%s4248_s9] ss:$0 sm:$0xff] }
 0x825   :  { %v1781_v55 = vpop.f32.mrf.mxu1  ;;  %v1852_v24 = vpop.f32.mrf.mxu0 }
 0x826   :  { %v2193_v25 = vmul.f32 -1.442695, %v1855_v16  ;;  %v1856_v52 = vadd.f32 %v1781_v55, %v4513_v54  ;;  %v1858_v19 = vadd.f32 %v1852_v24, %v4514_v17 }
 0x828   :  { %2377 = vpow2.f32 %v2193_v25  ;;  %v2194_v23 = vmul.f32 -1.442695, %v1856_v52  ;;  %v2195_v43 = vmul.f32 -1.442695, %v1858_v19 }
 0x82a   :  { %2379 = vpow2.f32 %v2194_v23 }
 0x82b   :  { %2381 = vtanh.f32 %v1857_v39 }
 0x82c   :  { %2383 = vpow2.f32 %v2195_v43 }
 0x835   :  { %v2378_v44 = vpop.eup %2377 }
 0x836   :  { %v1862_v35 = vadd.f32 1.0, %v2378_v44 }
 0x837   :  { %v2380_v46 = vpop.eup %2379 }
 0x838   :  { %2385 = vrcp.f32 %v1862_v35  ;;  %v1868_v47 = vadd.f32 1.0, %v2380_v46  ;;  %v2382_v48 = vpop.eup %2381 }
 0x839   :  { %v2384_v49 = vpop.eup %2383 }
 0x83a   :  { %2387 = vrcp.f32 %v1868_v47  ;;  %v1875_v0 = vadd.f32 1.0, %v2384_v49 }
 0x83c   :  { %2389 = vrcp.f32 %v1875_v0 }
 0x845   :  { %v2386_v51 = vpop.eup %2385 }
 0x846   :  { %v1879_v57 = vmul.f32 %v2386_v51, %v2382_v48 }
 0x847   :  { %v2388_v58 = vpop.eup %2387 }
 0x848   :  { %v1878_v31 = vmul.f32 %v2388_v58, %v4087_v59  ;;  %v2060_v59 = vld [vmem:[%s4247_s8 + $0x18] sm:$0xff] }
 0x849   :  { %v2390_v62 = vpop.eup %2389 }
 0x84a   :  { %v4160_v27 = vadd.f32 %v1879_v57, %v1878_v31 }
 0x84c   :  { %2391 = vtanh.f32 %v4160_v27 }
 0x859   :  { %v2392_v22 = vpop.eup %2391 }
 0x85a   :  { %v1882_v11 = vmul.f32 %v2392_v22, %v2390_v62 }
 0x85c   :  { %1952 = vmatmul.mubr.f32.vlgmr.msra.gmra.mxu1 %v1882_v11  ;;  %2023 = vmatmul.mubr.f32.vlgmr.msra.gmra.mxu0 %v1882_v11 }
 0x85d   :  { %2244 = vmatpush3.msra.mxu1 %v2072_v18  ;;  %2275 = vmatprep.mubr.msk.f32.mxu1 %vm2496_vm9, %v4510_v53 }
 0x85e   :  { %2245 = vmatprep.subr.mxu1 %v4510_v53 }
 0x85f   :  { %2246 = vmatpush3.msra.mxu1 %v2071_v60 }
 0x860   :  { %2247 = vmatprep.subr.mxu1 %v4510_v53 }
 0x861   :  { %2248 = vmatpush3.msra.mxu1 %v2070_v8 }
 0x862   :  { %2249 = vmatprep.subr.mxu1 %v4510_v53 }
 0x863   :  { %2250 = vmatpush3.msra.mxu1 %v2069_v6 }
 0x864   :  { %2251 = vmatprep.subr.mxu1 %v4510_v53 }
 0x865   :  { %2252 = vmatpush3.msra.mxu1 %v2068_v7 }
 0x866   :  { %2253 = vmatprep.subr.mxu1 %v4510_v53 }
 0x867   :  { %2254 = vmatpush3.msra.mxu1 %v2067_v12 }
 0x868   :  { %2255 = vmatprep.subr.mxu1 %v4510_v53 }
 0x869   :  { %2256 = vmatpush3.msra.mxu1 %v2066_v10 }
 0x86a   :  { %2257 = vmatprep.subr.mxu1 %v4510_v53 }
 0x86b   :  { %2258 = vmatpush3.msra.mxu1 %v2065_v13 }
 0x86c   :  { %2259 = vmatprep.subr.mxu1 %v4510_v53 }
 0x86d   :  { %2260 = vmatpush3.msra.mxu1 %v2064_v5 }
 0x86e   :  { %2261 = vmatprep.subr.mxu1 %v4510_v53 }
 0x86f   :  { %2262 = vmatpush3.msra.mxu1 %v2063_v2 }
 0x870   :  { %2263 = vmatprep.subr.mxu1 %v4510_v53 }
 0x871   :  { %2264 = vmatpush3.msra.mxu1 %v2062_v1 }
 0x872   :  { %2265 = vmatprep.subr.mxu1 %v4510_v53 }
 0x873   :  { %2266 = vmatpush3.msra.mxu1 %v2061_v21 }
 0x874   :  { %2267 = vmatprep.subr.mxu1 %v4510_v53 }
 0x875   :  { %2268 = vmatpush3.msra.mxu1 %v2060_v59 }
 0x876   :  { %2269 = vmatprep.subr.mxu1 %v4510_v53 }
 0x877   :  { %2270 = vmatpush3.msra.mxu1 %v2059_v14 }
 0x878   :  { %2271 = vmatprep.subr.mxu1 %v4510_v53 }
 0x879   :  { %2272 = vmatpush3.msra.mxu1 %v2058_v63 }
 0x87a   :  { %2273 = vmatprep.subr.mxu1 %v4510_v53 }
 0x87b   :  { %2274 = vmatpush3.msra.mxu1 %v2057_v15 }
 0x91c   :  { %v1953_v26 = vpop.f32.mrf.mxu1  ;;  %v2024_v34 = vpop.f32.mrf.mxu0 }
 0x91d   :  { %v2029_v28 = vadd.f32 %v1953_v26, %v4516_v40  ;;  %v2031_v42 = vadd.f32 %v2024_v34, %v4519_v41 }
 0x91e   :  { %v1955_v29 = vpop.f32.mrf.mxu1  ;;  %v2026_v61 = vpop.f32.mrf.mxu0 }
 0x91f   :  { %v2196_v30 = vmul.f32 -1.442695, %v2029_v28  ;;  %v2030_v33 = vadd.f32 %v1955_v29, %v4517_v32  ;;  %v2032_v9 = vadd.f32 %v2026_v61, %v4518_v50 }
 0x921   :  { %2393 = vpow2.f32 %v2196_v30  ;;  %v2197_v37 = vmul.f32 -1.442695, %v2030_v33  ;;  %v2198_v36 = vmul.f32 -1.442695, %v2032_v9 }
 0x923   :  { %2395 = vpow2.f32 %v2197_v37 }
 0x924   :  { %2397 = vtanh.f32 %v2031_v42 }
 0x925   :  { %2399 = vpow2.f32 %v2198_v36 }
 0x92e   :  { %v2394_v38 = vpop.eup %2393 }
 0x92f   :  { %v2036_v53 = vadd.f32 1.0, %v2394_v38 }
 0x930   :  { %v2396_v3 = vpop.eup %2395 }
 0x931   :  { %2401 = vrcp.f32 %v2036_v53  ;;  %v2042_v4 = vadd.f32 1.0, %v2396_v3  ;;  %v2398_v45 = vpop.eup %2397 }
 0x932   :  { %v2400_v16 = vpop.eup %2399 }
 0x933   :  { %2403 = vrcp.f32 %v2042_v4  ;;  %v2049_v52 = vadd.f32 1.0, %v2400_v16 }
 0x935   :  { %2405 = vrcp.f32 %v2049_v52 }
 0x93e   :  { %v2402_v55 = vpop.eup %2401 }
 0x93f   :  { %v2053_v25 = vmul.f32 %v2402_v55, %v2398_v45 }
 0x940   :  { %v2404_v54 = vpop.eup %2403 }
 0x941   :  { %v2052_v56 = vmul.f32 %v2404_v54, %v4160_v27 }
 0x942   :  { %v2406_v24 = vpop.eup %2405 }
 0x943   :  { %v2054_v23 = vadd.f32 %v2053_v25, %v2052_v56 }
 0x945   :  { %2407 = vtanh.f32 %v2054_v23 }
 0x952   :  { %v2408_v17 = vpop.eup %2407 }
 0x953   :  { %v2056_v19 = vmul.f32 %v2408_v17, %v2406_v24 }
 0x955   :  { %2276 = vmatmul.mubr.f32.vlgmr.msra.gmra.mxu1 %v2056_v19 }
 0xa15   :  { %v2146_v39 = vpop.f32.mrf.mxu1 }
 0xa16   :  { %v2147_v43 = vadd.f32 %v2199_v20, %v2146_v39 }
 0xa17   :  { %v2277_v44 = vpop.f32.mrf.mxu1 }
 0xa18   :  { %2150 = vst.msk [vmem:[#allocation4] sm:$0xff] %vm54_vm0, %v2147_v43 }
 0xa19   :  { %2484 = shalt.err (!%p2481_p4)
}
 0xa1a   :  { %2160 = dma.vmem_to_hbm [thread:$0]  %s2158_s30, 128, %s4249_s10, [#allocation5]  }
 0xa1b   :  { %2493 = dma.done.wait [#allocation5], 128  }
 0xa1c   :  { %2494 = vsyncadd [#allocation5], 4294967168 }
 0xa1d   :  { %2164 = vsyncpa [#allocation5], 1 }

</bundles_post_ra>
